<compile_context>
chip_gen: v7x
topology: tpu7x:2x2x1
jax: 0.10.0
libtpu: 0.0.40
codegen_flags: <defaults>
</compile_context>

<pallas_src>
import jax
import jax.numpy as jnp
from jax.experimental import pallas as pl
from jax.experimental.pallas import tpu as pltpu


def gru_attn_kernel(x_ref, h0_ref, prevx_ref,
                    w_ih_rz_t_ref, w_ih_n_t_ref, b_rz_ref, b_in_ref, b_hn_ref,
                    w_hh_rz_t_ref, w_hh_n_t_ref,
                    w1_ref, w2_ref, v_att_ref,
                    wl1_ref, wl2_ref, b_lin_ref,
                    out_ref, hi_ref, xi_ref):
    B, S, H = xi_ref.shape

    # ---- hoist weight loads / broadcasts out of the unrolled recurrence ----
    w_hh_rz_t = w_hh_rz_t_ref[...]                                   # [H, 2H]
    w_hh_n_t = w_hh_n_t_ref[...]                                     # [H, H]
    b_hn = jnp.broadcast_to(b_hn_ref[...], (B, H))                   # [B, H]
    h0 = h0_ref[...]                                                 # [B, H]

    # ---- input projection hoisted out of the recurrence: one GEMM per gate group ----
    x2 = x_ref[...]                                                  # [B*S, D_in]
    gi_rz = (jnp.dot(x2, w_ih_rz_t_ref[...], preferred_element_type=jnp.float32)
             + b_rz_ref[...]).reshape(B, S, 2 * H)                   # b_ih + b_hh (r,z) folded
    gi_n = (jnp.dot(x2, w_ih_n_t_ref[...], preferred_element_type=jnp.float32)
            + b_in_ref[...]).reshape(B, S, H)                        # b_ih (n) folded

    # attention uses the *initial* hidden state (reference semantics)
    part_h = jnp.dot(h0, w2_ref[...], preferred_element_type=jnp.float32)   # [B, H]

    # ---- GRU recurrence (PyTorch gate order r, z, n), fully unrolled ----
    h = h0
    for t in range(S):
        gh_rz = jnp.dot(h, w_hh_rz_t, preferred_element_type=jnp.float32)        # [B, 2H]
        gh_n = jnp.dot(h, w_hh_n_t, preferred_element_type=jnp.float32) + b_hn   # [B, H]

        rz = jax.nn.sigmoid(gi_rz[:, t, :] + gh_rz)                  # one EUP push for r and z
        r = rz[:, :H]
        z = rz[:, H:]
        n = jnp.tanh(gi_n[:, t, :] + r * gh_n)
        h = n + z * (h - n)                                          # PyTorch's GRU update form

        xi_ref[:, t:t + 1, :] = h[:, None, :]                        # batch-first xi

    hi_ref[...] = h                                                  # final hidden state

    # ---- batched additive attention over the full sequence (one MXU push, one tanh) ----
    xi_all = xi_ref[...]                                             # [B, S, H]
    att_pre = jnp.dot(xi_all.reshape(B * S, H), w1_ref[...],
                      preferred_element_type=jnp.float32).reshape(B, S, H)
    e = jnp.sum(jnp.tanh(att_pre + part_h[:, None, :]) * v_att_ref[...][None, :, :],
                axis=-1)                                             # [B, S]

    # softmax over the sequence dim
    e = e - jnp.max(e, axis=-1, keepdims=True)
    p = jnp.exp(e)
    att = p / jnp.sum(p, axis=-1, keepdims=True)                     # [B, S]

    # ---- weighted sum over prev_x, concat with last GRU output, linear head ----
    ws = jnp.sum(att[:, :, None] * prevx_ref[...], axis=1)           # [B, H]
    logits = (jnp.dot(ws, wl1_ref[...], preferred_element_type=jnp.float32)
              + jnp.dot(h, wl2_ref[...], preferred_element_type=jnp.float32)
              + b_lin_ref[...])                                      # [B, O]
    out_ref[...] = logits


def gru_rnn_forward(params, input_x, hj, prev_x):
    """Mirrors GRU_RNN.forward(input_x, hj, prev_x) with att=True, n_layers=1."""
    B, S, D_in = input_x.shape
    H = params["w_hh"].shape[1]
    O = params["w_lin"].shape[0]

    h0 = hj[-1]                                                      # [B, H]
    x2 = input_x.reshape(B * S, D_in)                                # free layout-preserving reshape

    # ----- weight-only preprocessing (tiny; no input-dependent math in the wrapper) -----
    w_ih_t = params["w_ih"].T                                        # [D_in, 3H]
    w_ih_rz_t = w_ih_t[:, :2 * H]                                    # [D_in, 2H]
    w_ih_n_t = w_ih_t[:, 2 * H:]                                     # [D_in, H]
    b_rz = (params["b_ih"][:2 * H] + params["b_hh"][:2 * H]).reshape(1, 2 * H)
    b_in = params["b_ih"][2 * H:].reshape(1, H)
    b_hn = params["b_hh"][2 * H:].reshape(1, H)

    w_hh_t = params["w_hh"].T                                        # [H, 3H]
    w_hh_rz_t = w_hh_t[:, :2 * H]                                    # [H, 2H]
    w_hh_n_t = w_hh_t[:, 2 * H:]                                     # [H, H]

    w_att_t = params["w_att"].T                                      # [2H, H]
    w1 = w_att_t[:H, :]                                              # acts on xi
    w2 = w_att_t[H:, :]                                              # acts on h0
    v_att = params["v_att"].reshape(1, H)

    w_lin_t = params["w_lin"].T                                      # [2H, O]
    wl1 = w_lin_t[:H, :]                                             # acts on weighted_sum
    wl2 = w_lin_t[H:, :]                                             # acts on xi[:, -1, :]
    b_lin = params["b_lin"].reshape(1, O)

    vmem = pl.BlockSpec(memory_space=pltpu.MemorySpace.VMEM)
    logits, hi, xi = pl.pallas_call(
        gru_attn_kernel,
        out_shape=(
            jax.ShapeDtypeStruct((B, O), jnp.float32),               # per-batch logits
            jax.ShapeDtypeStruct((B, H), jnp.float32),               # hi (squeezed)
            jax.ShapeDtypeStruct((B, S, H), jnp.float32),            # xi, batch-first
        ),
        in_specs=[vmem] * 16,
        out_specs=(vmem, vmem, vmem),
    )(x2, h0, prev_x,
      w_ih_rz_t, w_ih_n_t, b_rz, b_in, b_hn,
      w_hh_rz_t, w_hh_n_t,
      w1, w2, v_att, wl1, wl2, b_lin)

    # reference repeats the same logits across the sequence dimension
    out = jnp.broadcast_to(logits[:, None, :], (B, S, O))            # [B, S, O]
    return out, hi[None, :, :], xi                                   # ([B,S,O], [1,B,H], [B,S,H])


def init_params(key, input_dim, hidden_dim, output_dim):
    ks = jax.random.split(key, 8)
    kh = 1.0 / jnp.sqrt(hidden_dim)
    kl = 1.0 / jnp.sqrt(2 * hidden_dim)
    u = lambda k, shape, lim: jax.random.uniform(k, shape, jnp.float32, -lim, lim)
    return {
        # nn.GRU(input_dim, hidden_dim, num_layers=1, batch_first=True)
        "w_ih": u(ks[0], (3 * hidden_dim, input_dim), kh),
        "w_hh": u(ks[1], (3 * hidden_dim, hidden_dim), kh),
        "b_ih": u(ks[2], (3 * hidden_dim,), kh),
        "b_hh": u(ks[3], (3 * hidden_dim,), kh),
        # Attention: W = Linear(2H, H, bias=False), V = rand(H)
        "w_att": u(ks[4], (hidden_dim, 2 * hidden_dim), kl),
        "v_att": jax.random.uniform(ks[5], (hidden_dim,), jnp.float32),
        # linear = Linear(2H, output_dim)
        "w_lin": u(ks[6], (output_dim, 2 * hidden_dim), kl),
        "b_lin": u(ks[7], (output_dim,), kl),
    }
    # TODO(synk): nn.Dropout(0.3) and self.func (Softmax) are declared but unused in forward; omitted.


if __name__ == "__main__":
    B, S = 2, 8                   # batch, seq_length (interpreting the global seq_length as S)
    D_IN, H, O, N_LAYERS = 300, 32, 15, 1

    root = jax.random.PRNGKey(0)
    k_par, k_x, k_h, k_p = jax.random.split(root, 4)

    params = init_params(k_par, D_IN, H, O)
    input_x = jax.random.normal(k_x, (B, S, D_IN), jnp.float32)   # [b, seq, input_dim]
    hj = 0.1 * jax.random.normal(k_h, (N_LAYERS, B, H), jnp.float32)
    prev_x = jax.random.normal(k_p, (B, S, H), jnp.float32)

    fwd = jax.jit(gru_rnn_forward)
    out, hi, xi = fwd(params, input_x, hj, prev_x)
    jax.block_until_ready((out, hi, xi))

    assert out.shape == (B, S, O)
    assert hi.shape == (N_LAYERS, B, H)
    assert xi.shape == (B, S, H)
    print("KERNEL_OK")
</pallas_src>

<mosaic_0001>
module attributes {stable_mosaic.version = 11 : i64} {
  func.func @gru_attn_kernel(%arg0: memref<16x300xf32, #tpu.memory_space<vmem>>, %arg1: memref<2x32xf32, #tpu.memory_space<vmem>>, %arg2: memref<2x8x32xf32, #tpu.memory_space<vmem>>, %arg3: memref<300x64xf32, #tpu.memory_space<vmem>>, %arg4: memref<300x32xf32, #tpu.memory_space<vmem>>, %arg5: memref<1x64xf32, #tpu.memory_space<vmem>>, %arg6: memref<1x32xf32, #tpu.memory_space<vmem>>, %arg7: memref<1x32xf32, #tpu.memory_space<vmem>>, %arg8: memref<32x64xf32, #tpu.memory_space<vmem>>, %arg9: memref<32x32xf32, #tpu.memory_space<vmem>>, %arg10: memref<32x32xf32, #tpu.memory_space<vmem>>, %arg11: memref<32x32xf32, #tpu.memory_space<vmem>>, %arg12: memref<1x32xf32, #tpu.memory_space<vmem>>, %arg13: memref<32x15xf32, #tpu.memory_space<vmem>>, %arg14: memref<32x15xf32, #tpu.memory_space<vmem>>, %arg15: memref<1x15xf32, #tpu.memory_space<vmem>>, %arg16: memref<2x15xf32, #tpu.memory_space<vmem>>, %arg17: memref<2x32xf32, #tpu.memory_space<vmem>>, %arg18: memref<2x8x32xf32, #tpu.memory_space<vmem>>) attributes {dimension_semantics = [], scalar_prefetch = 0 : i64, scratch_operands = 0 : i64, tpu.core_type = #tpu.core_type<tc>} {
    %c0 = arith.constant 0 : index
    %c0_0 = arith.constant 0 : index
    %0 = vector.load %arg8[%c0, %c0_0] : memref<32x64xf32, #tpu.memory_space<vmem>>, vector<32x64xf32>
    %c0_1 = arith.constant 0 : index
    %c0_2 = arith.constant 0 : index
    %1 = vector.load %arg9[%c0_1, %c0_2] : memref<32x32xf32, #tpu.memory_space<vmem>>, vector<32x32xf32>
    %c0_3 = arith.constant 0 : index
    %c0_4 = arith.constant 0 : index
    %2 = vector.load %arg7[%c0_3, %c0_4] : memref<1x32xf32, #tpu.memory_space<vmem>>, vector<1x32xf32>
    %3 = vector.shape_cast %2 : vector<1x32xf32> to vector<1x32xf32>
    %4 = vector.broadcast %3 : vector<1x32xf32> to vector<2x32xf32>
    %c0_5 = arith.constant 0 : index
    %c0_6 = arith.constant 0 : index
    %5 = vector.load %arg1[%c0_5, %c0_6] : memref<2x32xf32, #tpu.memory_space<vmem>>, vector<2x32xf32>
    %c0_7 = arith.constant 0 : index
    %c0_8 = arith.constant 0 : index
    %6 = vector.load %arg0[%c0_7, %c0_8] : memref<16x300xf32, #tpu.memory_space<vmem>>, vector<16x300xf32>
    %c0_9 = arith.constant 0 : index
    %c0_10 = arith.constant 0 : index
    %7 = vector.load %arg3[%c0_9, %c0_10] : memref<300x64xf32, #tpu.memory_space<vmem>>, vector<300x64xf32>
    %cst = arith.constant dense<0.000000e+00> : vector<16x64xf32>
    %8 = tpu.matmul %6, %7, %cst {dimension_numbers = #tpu.dot_dimension_numbers<[1], [0], [0], [1], [0, 0, 1, 1], [], []>} : vector<16x300xf32>, vector<300x64xf32>, vector<16x64xf32> -> vector<16x64xf32>
    %c0_11 = arith.constant 0 : index
    %c0_12 = arith.constant 0 : index
    %9 = vector.load %arg5[%c0_11, %c0_12] : memref<1x64xf32, #tpu.memory_space<vmem>>, vector<1x64xf32>
    %10 = vector.broadcast %9 : vector<1x64xf32> to vector<16x64xf32>
    %11 = arith.addf %8, %10 : vector<16x64xf32>
    %12 = vector.shape_cast %11 : vector<16x64xf32> to vector<2x8x64xf32>
    %c0_13 = arith.constant 0 : index
    %c0_14 = arith.constant 0 : index
    %13 = vector.load %arg4[%c0_13, %c0_14] : memref<300x32xf32, #tpu.memory_space<vmem>>, vector<300x32xf32>
    %cst_15 = arith.constant dense<0.000000e+00> : vector<16x32xf32>
    %14 = tpu.matmul %6, %13, %cst_15 {dimension_numbers = #tpu.dot_dimension_numbers<[1], [0], [0], [1], [0, 0, 1, 1], [], []>} : vector<16x300xf32>, vector<300x32xf32>, vector<16x32xf32> -> vector<16x32xf32>
    %c0_16 = arith.constant 0 : index
    %c0_17 = arith.constant 0 : index
    %15 = vector.load %arg6[%c0_16, %c0_17] : memref<1x32xf32, #tpu.memory_space<vmem>>, vector<1x32xf32>
    %16 = vector.broadcast %15 : vector<1x32xf32> to vector<16x32xf32>
    %17 = arith.addf %14, %16 : vector<16x32xf32>
    %18 = vector.shape_cast %17 : vector<16x32xf32> to vector<2x8x32xf32>
    %c0_18 = arith.constant 0 : index
    %c0_19 = arith.constant 0 : index
    %19 = vector.load %arg11[%c0_18, %c0_19] : memref<32x32xf32, #tpu.memory_space<vmem>>, vector<32x32xf32>
    %cst_20 = arith.constant dense<0.000000e+00> : vector<2x32xf32>
    %20 = tpu.matmul %5, %19, %cst_20 {dimension_numbers = #tpu.dot_dimension_numbers<[1], [0], [0], [1], [0, 0, 1, 1], [], []>} : vector<2x32xf32>, vector<32x32xf32>, vector<2x32xf32> -> vector<2x32xf32>
    %cst_21 = arith.constant dense<0.000000e+00> : vector<2x64xf32>
    %21 = tpu.matmul %5, %0, %cst_21 {dimension_numbers = #tpu.dot_dimension_numbers<[1], [0], [0], [1], [0, 0, 1, 1], [], []>} : vector<2x32xf32>, vector<32x64xf32>, vector<2x64xf32> -> vector<2x64xf32>
    %cst_22 = arith.constant dense<0.000000e+00> : vector<2x32xf32>
    %22 = tpu.matmul %5, %1, %cst_22 {dimension_numbers = #tpu.dot_dimension_numbers<[1], [0], [0], [1], [0, 0, 1, 1], [], []>} : vector<2x32xf32>, vector<32x32xf32>, vector<2x32xf32> -> vector<2x32xf32>
    %23 = arith.addf %22, %4 : vector<2x32xf32>
    %24 = vector.extract_strided_slice %12 {offsets = [0, 0, 0], sizes = [2, 1, 64], strides = [1, 1, 1]} : vector<2x8x64xf32> to vector<2x1x64xf32>
    %25 = vector.shape_cast %24 : vector<2x1x64xf32> to vector<2x64xf32>
    %26 = arith.addf %25, %21 : vector<2x64xf32>
    %27 = arith.negf %26 : vector<2x64xf32>
    %28 = math.exp %27 : vector<2x64xf32>
    %cst_23 = arith.constant 1.000000e+00 : f32
    %29 = vector.broadcast %cst_23 : f32 to vector<2x64xf32>
    %30 = arith.addf %29, %28 : vector<2x64xf32>
    %31 = arith.divf %29, %30 : vector<2x64xf32>
    %32 = vector.extract_strided_slice %31 {offsets = [0, 0], sizes = [2, 32], strides = [1, 1]} : vector<2x64xf32> to vector<2x32xf32>
    %33 = vector.extract_strided_slice %31 {offsets = [0, 32], sizes = [2, 32], strides = [1, 1]} : vector<2x64xf32> to vector<2x32xf32>
    %34 = vector.extract_strided_slice %18 {offsets = [0, 0, 0], sizes = [2, 1, 32], strides = [1, 1, 1]} : vector<2x8x32xf32> to vector<2x1x32xf32>
    %35 = vector.shape_cast %34 : vector<2x1x32xf32> to vector<2x32xf32>
    %36 = arith.mulf %32, %23 : vector<2x32xf32>
    %37 = arith.addf %35, %36 : vector<2x32xf32>
    %38 = math.tanh %37 : vector<2x32xf32>
    %39 = arith.subf %5, %38 : vector<2x32xf32>
    %40 = arith.mulf %33, %39 : vector<2x32xf32>
    %41 = arith.addf %38, %40 : vector<2x32xf32>
    %42 = vector.shape_cast %41 : vector<2x32xf32> to vector<2x1x32xf32>
    %c0_24 = arith.constant 0 : index
    %c0_25 = arith.constant 0 : index
    %c0_26 = arith.constant 0 : index
    %43 = vector.load %arg18[%c0_24, %c0_25, %c0_26] : memref<2x8x32xf32, #tpu.memory_space<vmem>>, vector<2x1x32xf32>
    tpu.vector_store %arg18[%c0_24, %c0_25, %c0_26], %42 {strides = array<i32>} : memref<2x8x32xf32, #tpu.memory_space<vmem>>, vector<2x1x32xf32>,
    %cst_27 = arith.constant dense<0.000000e+00> : vector<2x64xf32>
    %44 = tpu.matmul %41, %0, %cst_27 {dimension_numbers = #tpu.dot_dimension_numbers<[1], [0], [0], [1], [0, 0, 1, 1], [], []>} : vector<2x32xf32>, vector<32x64xf32>, vector<2x64xf32> -> vector<2x64xf32>
    %cst_28 = arith.constant dense<0.000000e+00> : vector<2x32xf32>
    %45 = tpu.matmul %41, %1, %cst_28 {dimension_numbers = #tpu.dot_dimension_numbers<[1], [0], [0], [1], [0, 0, 1, 1], [], []>} : vector<2x32xf32>, vector<32x32xf32>, vector<2x32xf32> -> vector<2x32xf32>
    %46 = arith.addf %45, %4 : vector<2x32xf32>
    %47 = vector.extract_strided_slice %12 {offsets = [0, 1, 0], sizes = [2, 1, 64], strides = [1, 1, 1]} : vector<2x8x64xf32> to vector<2x1x64xf32>
    %48 = vector.shape_cast %47 : vector<2x1x64xf32> to vector<2x64xf32>
    %49 = arith.addf %48, %44 : vector<2x64xf32>
    %50 = arith.negf %49 : vector<2x64xf32>
    %51 = math.exp %50 : vector<2x64xf32>
    %cst_29 = arith.constant 1.000000e+00 : f32
    %52 = vector.broadcast %cst_29 : f32 to vector<2x64xf32>
    %53 = arith.addf %52, %51 : vector<2x64xf32>
    %54 = arith.divf %52, %53 : vector<2x64xf32>
    %55 = vector.extract_strided_slice %54 {offsets = [0, 0], sizes = [2, 32], strides = [1, 1]} : vector<2x64xf32> to vector<2x32xf32>
    %56 = vector.extract_strided_slice %54 {offsets = [0, 32], sizes = [2, 32], strides = [1, 1]} : vector<2x64xf32> to vector<2x32xf32>
    %57 = vector.extract_strided_slice %18 {offsets = [0, 1, 0], sizes = [2, 1, 32], strides = [1, 1, 1]} : vector<2x8x32xf32> to vector<2x1x32xf32>
    %58 = vector.shape_cast %57 : vector<2x1x32xf32> to vector<2x32xf32>
    %59 = arith.mulf %55, %46 : vector<2x32xf32>
    %60 = arith.addf %58, %59 : vector<2x32xf32>
    %61 = math.tanh %60 : vector<2x32xf32>
    %62 = arith.subf %41, %61 : vector<2x32xf32>
    %63 = arith.mulf %56, %62 : vector<2x32xf32>
    %64 = arith.addf %61, %63 : vector<2x32xf32>
    %65 = vector.shape_cast %64 : vector<2x32xf32> to vector<2x1x32xf32>
    %c0_30 = arith.constant 0 : index
    %c1 = arith.constant 1 : index
    %c0_31 = arith.constant 0 : index
    %66 = vector.load %arg18[%c0_30, %c1, %c0_31] : memref<2x8x32xf32, #tpu.memory_space<vmem>>, vector<2x1x32xf32>
    tpu.vector_store %arg18[%c0_30, %c1, %c0_31], %65 {strides = array<i32>} : memref<2x8x32xf32, #tpu.memory_space<vmem>>, vector<2x1x32xf32>,
    %cst_32 = arith.constant dense<0.000000e+00> : vector<2x64xf32>
    %67 = tpu.matmul %64, %0, %cst_32 {dimension_numbers = #tpu.dot_dimension_numbers<[1], [0], [0], [1], [0, 0, 1, 1], [], []>} : vector<2x32xf32>, vector<32x64xf32>, vector<2x64xf32> -> vector<2x64xf32>
    %cst_33 = arith.constant dense<0.000000e+00> : vector<2x32xf32>
    %68 = tpu.matmul %64, %1, %cst_33 {dimension_numbers = #tpu.dot_dimension_numbers<[1], [0], [0], [1], [0, 0, 1, 1], [], []>} : vector<2x32xf32>, vector<32x32xf32>, vector<2x32xf32> -> vector<2x32xf32>
    %69 = arith.addf %68, %4 : vector<2x32xf32>
    %70 = vector.extract_strided_slice %12 {offsets = [0, 2, 0], sizes = [2, 1, 64], strides = [1, 1, 1]} : vector<2x8x64xf32> to vector<2x1x64xf32>
    %71 = vector.shape_cast %70 : vector<2x1x64xf32> to vector<2x64xf32>
    %72 = arith.addf %71, %67 : vector<2x64xf32>
    %73 = arith.negf %72 : vector<2x64xf32>
    %74 = math.exp %73 : vector<2x64xf32>
    %cst_34 = arith.constant 1.000000e+00 : f32
    %75 = vector.broadcast %cst_34 : f32 to vector<2x64xf32>
    %76 = arith.addf %75, %74 : vector<2x64xf32>
    %77 = arith.divf %75, %76 : vector<2x64xf32>
    %78 = vector.extract_strided_slice %77 {offsets = [0, 0], sizes = [2, 32], strides = [1, 1]} : vector<2x64xf32> to vector<2x32xf32>
    %79 = vector.extract_strided_slice %77 {offsets = [0, 32], sizes = [2, 32], strides = [1, 1]} : vector<2x64xf32> to vector<2x32xf32>
    %80 = vector.extract_strided_slice %18 {offsets = [0, 2, 0], sizes = [2, 1, 32], strides = [1, 1, 1]} : vector<2x8x32xf32> to vector<2x1x32xf32>
    %81 = vector.shape_cast %80 : vector<2x1x32xf32> to vector<2x32xf32>
    %82 = arith.mulf %78, %69 : vector<2x32xf32>
    %83 = arith.addf %81, %82 : vector<2x32xf32>
    %84 = math.tanh %83 : vector<2x32xf32>
    %85 = arith.subf %64, %84 : vector<2x32xf32>
    %86 = arith.mulf %79, %85 : vector<2x32xf32>
    %87 = arith.addf %84, %86 : vector<2x32xf32>
    %88 = vector.shape_cast %87 : vector<2x32xf32> to vector<2x1x32xf32>
    %c0_35 = arith.constant 0 : index
    %c2 = arith.constant 2 : index
    %c0_36 = arith.constant 0 : index
    %89 = vector.load %arg18[%c0_35, %c2, %c0_36] : memref<2x8x32xf32, #tpu.memory_space<vmem>>, vector<2x1x32xf32>
    tpu.vector_store %arg18[%c0_35, %c2, %c0_36], %88 {strides = array<i32>} : memref<2x8x32xf32, #tpu.memory_space<vmem>>, vector<2x1x32xf32>,
    %cst_37 = arith.constant dense<0.000000e+00> : vector<2x64xf32>
    %90 = tpu.matmul %87, %0, %cst_37 {dimension_numbers = #tpu.dot_dimension_numbers<[1], [0], [0], [1], [0, 0, 1, 1], [], []>} : vector<2x32xf32>, vector<32x64xf32>, vector<2x64xf32> -> vector<2x64xf32>
    %cst_38 = arith.constant dense<0.000000e+00> : vector<2x32xf32>
    %91 = tpu.matmul %87, %1, %cst_38 {dimension_numbers = #tpu.dot_dimension_numbers<[1], [0], [0], [1], [0, 0, 1, 1], [], []>} : vector<2x32xf32>, vector<32x32xf32>, vector<2x32xf32> -> vector<2x32xf32>
    %92 = arith.addf %91, %4 : vector<2x32xf32>
    %93 = vector.extract_strided_slice %12 {offsets = [0, 3, 0], sizes = [2, 1, 64], strides = [1, 1, 1]} : vector<2x8x64xf32> to vector<2x1x64xf32>
    %94 = vector.shape_cast %93 : vector<2x1x64xf32> to vector<2x64xf32>
    %95 = arith.addf %94, %90 : vector<2x64xf32>
    %96 = arith.negf %95 : vector<2x64xf32>
    %97 = math.exp %96 : vector<2x64xf32>
    %cst_39 = arith.constant 1.000000e+00 : f32
    %98 = vector.broadcast %cst_39 : f32 to vector<2x64xf32>
    %99 = arith.addf %98, %97 : vector<2x64xf32>
    %100 = arith.divf %98, %99 : vector<2x64xf32>
    %101 = vector.extract_strided_slice %100 {offsets = [0, 0], sizes = [2, 32], strides = [1, 1]} : vector<2x64xf32> to vector<2x32xf32>
    %102 = vector.extract_strided_slice %100 {offsets = [0, 32], sizes = [2, 32], strides = [1, 1]} : vector<2x64xf32> to vector<2x32xf32>
    %103 = vector.extract_strided_slice %18 {offsets = [0, 3, 0], sizes = [2, 1, 32], strides = [1, 1, 1]} : vector<2x8x32xf32> to vector<2x1x32xf32>
    %104 = vector.shape_cast %103 : vector<2x1x32xf32> to vector<2x32xf32>
    %105 = arith.mulf %101, %92 : vector<2x32xf32>
    %106 = arith.addf %104, %105 : vector<2x32xf32>
    %107 = math.tanh %106 : vector<2x32xf32>
    %108 = arith.subf %87, %107 : vector<2x32xf32>
    %109 = arith.mulf %102, %108 : vector<2x32xf32>
    %110 = arith.addf %107, %109 : vector<2x32xf32>
    %111 = vector.shape_cast %110 : vector<2x32xf32> to vector<2x1x32xf32>
    %c0_40 = arith.constant 0 : index
    %c3 = arith.constant 3 : index
    %c0_41 = arith.constant 0 : index
    %112 = vector.load %arg18[%c0_40, %c3, %c0_41] : memref<2x8x32xf32, #tpu.memory_space<vmem>>, vector<2x1x32xf32>
    tpu.vector_store %arg18[%c0_40, %c3, %c0_41], %111 {strides = array<i32>} : memref<2x8x32xf32, #tpu.memory_space<vmem>>, vector<2x1x32xf32>,
    %cst_42 = arith.constant dense<0.000000e+00> : vector<2x64xf32>
    %113 = tpu.matmul %110, %0, %cst_42 {dimension_numbers = #tpu.dot_dimension_numbers<[1], [0], [0], [1], [0, 0, 1, 1], [], []>} : vector<2x32xf32>, vector<32x64xf32>, vector<2x64xf32> -> vector<2x64xf32>
    %cst_43 = arith.constant dense<0.000000e+00> : vector<2x32xf32>
    %114 = tpu.matmul %110, %1, %cst_43 {dimension_numbers = #tpu.dot_dimension_numbers<[1], [0], [0], [1], [0, 0, 1, 1], [], []>} : vector<2x32xf32>, vector<32x32xf32>, vector<2x32xf32> -> vector<2x32xf32>
    %115 = arith.addf %114, %4 : vector<2x32xf32>
    %116 = vector.extract_strided_slice %12 {offsets = [0, 4, 0], sizes = [2, 1, 64], strides = [1, 1, 1]} : vector<2x8x64xf32> to vector<2x1x64xf32>
    %117 = vector.shape_cast %116 : vector<2x1x64xf32> to vector<2x64xf32>
    %118 = arith.addf %117, %113 : vector<2x64xf32>
    %119 = arith.negf %118 : vector<2x64xf32>
    %120 = math.exp %119 : vector<2x64xf32>
    %cst_44 = arith.constant 1.000000e+00 : f32
    %121 = vector.broadcast %cst_44 : f32 to vector<2x64xf32>
    %122 = arith.addf %121, %120 : vector<2x64xf32>
    %123 = arith.divf %121, %122 : vector<2x64xf32>
    %124 = vector.extract_strided_slice %123 {offsets = [0, 0], sizes = [2, 32], strides = [1, 1]} : vector<2x64xf32> to vector<2x32xf32>
    %125 = vector.extract_strided_slice %123 {offsets = [0, 32], sizes = [2, 32], strides = [1, 1]} : vector<2x64xf32> to vector<2x32xf32>
    %126 = vector.extract_strided_slice %18 {offsets = [0, 4, 0], sizes = [2, 1, 32], strides = [1, 1, 1]} : vector<2x8x32xf32> to vector<2x1x32xf32>
    %127 = vector.shape_cast %126 : vector<2x1x32xf32> to vector<2x32xf32>
    %128 = arith.mulf %124, %115 : vector<2x32xf32>
    %129 = arith.addf %127, %128 : vector<2x32xf32>
    %130 = math.tanh %129 : vector<2x32xf32>
    %131 = arith.subf %110, %130 : vector<2x32xf32>
    %132 = arith.mulf %125, %131 : vector<2x32xf32>
    %133 = arith.addf %130, %132 : vector<2x32xf32>
    %134 = vector.shape_cast %133 : vector<2x32xf32> to vector<2x1x32xf32>
    %c0_45 = arith.constant 0 : index
    %c4 = arith.constant 4 : index
    %c0_46 = arith.constant 0 : index
    %135 = vector.load %arg18[%c0_45, %c4, %c0_46] : memref<2x8x32xf32, #tpu.memory_space<vmem>>, vector<2x1x32xf32>
    tpu.vector_store %arg18[%c0_45, %c4, %c0_46], %134 {strides = array<i32>} : memref<2x8x32xf32, #tpu.memory_space<vmem>>, vector<2x1x32xf32>,
    %cst_47 = arith.constant dense<0.000000e+00> : vector<2x64xf32>
    %136 = tpu.matmul %133, %0, %cst_47 {dimension_numbers = #tpu.dot_dimension_numbers<[1], [0], [0], [1], [0, 0, 1, 1], [], []>} : vector<2x32xf32>, vector<32x64xf32>, vector<2x64xf32> -> vector<2x64xf32>
    %cst_48 = arith.constant dense<0.000000e+00> : vector<2x32xf32>
    %137 = tpu.matmul %133, %1, %cst_48 {dimension_numbers = #tpu.dot_dimension_numbers<[1], [0], [0], [1], [0, 0, 1, 1], [], []>} : vector<2x32xf32>, vector<32x32xf32>, vector<2x32xf32> -> vector<2x32xf32>
    %138 = arith.addf %137, %4 : vector<2x32xf32>
    %139 = vector.extract_strided_slice %12 {offsets = [0, 5, 0], sizes = [2, 1, 64], strides = [1, 1, 1]} : vector<2x8x64xf32> to vector<2x1x64xf32>
    %140 = vector.shape_cast %139 : vector<2x1x64xf32> to vector<2x64xf32>
    %141 = arith.addf %140, %136 : vector<2x64xf32>
    %142 = arith.negf %141 : vector<2x64xf32>
    %143 = math.exp %142 : vector<2x64xf32>
    %cst_49 = arith.constant 1.000000e+00 : f32
    %144 = vector.broadcast %cst_49 : f32 to vector<2x64xf32>
    %145 = arith.addf %144, %143 : vector<2x64xf32>
    %146 = arith.divf %144, %145 : vector<2x64xf32>
    %147 = vector.extract_strided_slice %146 {offsets = [0, 0], sizes = [2, 32], strides = [1, 1]} : vector<2x64xf32> to vector<2x32xf32>
    %148 = vector.extract_strided_slice %146 {offsets = [0, 32], sizes = [2, 32], strides = [1, 1]} : vector<2x64xf32> to vector<2x32xf32>
    %149 = vector.extract_strided_slice %18 {offsets = [0, 5, 0], sizes = [2, 1, 32], strides = [1, 1, 1]} : vector<2x8x32xf32> to vector<2x1x32xf32>
    %150 = vector.shape_cast %149 : vector<2x1x32xf32> to vector<2x32xf32>
    %151 = arith.mulf %147, %138 : vector<2x32xf32>
    %152 = arith.addf %150, %151 : vector<2x32xf32>
    %153 = math.tanh %152 : vector<2x32xf32>
    %154 = arith.subf %133, %153 : vector<2x32xf32>
    %155 = arith.mulf %148, %154 : vector<2x32xf32>
    %156 = arith.addf %153, %155 : vector<2x32xf32>
    %157 = vector.shape_cast %156 : vector<2x32xf32> to vector<2x1x32xf32>
    %c0_50 = arith.constant 0 : index
    %c5 = arith.constant 5 : index
    %c0_51 = arith.constant 0 : index
    %158 = vector.load %arg18[%c0_50, %c5, %c0_51] : memref<2x8x32xf32, #tpu.memory_space<vmem>>, vector<2x1x32xf32>
    tpu.vector_store %arg18[%c0_50, %c5, %c0_51], %157 {strides = array<i32>} : memref<2x8x32xf32, #tpu.memory_space<vmem>>, vector<2x1x32xf32>,
    %cst_52 = arith.constant dense<0.000000e+00> : vector<2x64xf32>
    %159 = tpu.matmul %156, %0, %cst_52 {dimension_numbers = #tpu.dot_dimension_numbers<[1], [0], [0], [1], [0, 0, 1, 1], [], []>} : vector<2x32xf32>, vector<32x64xf32>, vector<2x64xf32> -> vector<2x64xf32>
    %cst_53 = arith.constant dense<0.000000e+00> : vector<2x32xf32>
    %160 = tpu.matmul %156, %1, %cst_53 {dimension_numbers = #tpu.dot_dimension_numbers<[1], [0], [0], [1], [0, 0, 1, 1], [], []>} : vector<2x32xf32>, vector<32x32xf32>, vector<2x32xf32> -> vector<2x32xf32>
    %161 = arith.addf %160, %4 : vector<2x32xf32>
    %162 = vector.extract_strided_slice %12 {offsets = [0, 6, 0], sizes = [2, 1, 64], strides = [1, 1, 1]} : vector<2x8x64xf32> to vector<2x1x64xf32>
    %163 = vector.shape_cast %162 : vector<2x1x64xf32> to vector<2x64xf32>
    %164 = arith.addf %163, %159 : vector<2x64xf32>
    %165 = arith.negf %164 : vector<2x64xf32>
    %166 = math.exp %165 : vector<2x64xf32>
    %cst_54 = arith.constant 1.000000e+00 : f32
    %167 = vector.broadcast %cst_54 : f32 to vector<2x64xf32>
    %168 = arith.addf %167, %166 : vector<2x64xf32>
    %169 = arith.divf %167, %168 : vector<2x64xf32>
    %170 = vector.extract_strided_slice %169 {offsets = [0, 0], sizes = [2, 32], strides = [1, 1]} : vector<2x64xf32> to vector<2x32xf32>
    %171 = vector.extract_strided_slice %169 {offsets = [0, 32], sizes = [2, 32], strides = [1, 1]} : vector<2x64xf32> to vector<2x32xf32>
    %172 = vector.extract_strided_slice %18 {offsets = [0, 6, 0], sizes = [2, 1, 32], strides = [1, 1, 1]} : vector<2x8x32xf32> to vector<2x1x32xf32>
    %173 = vector.shape_cast %172 : vector<2x1x32xf32> to vector<2x32xf32>
    %174 = arith.mulf %170, %161 : vector<2x32xf32>
    %175 = arith.addf %173, %174 : vector<2x32xf32>
    %176 = math.tanh %175 : vector<2x32xf32>
    %177 = arith.subf %156, %176 : vector<2x32xf32>
    %178 = arith.mulf %171, %177 : vector<2x32xf32>
    %179 = arith.addf %176, %178 : vector<2x32xf32>
    %180 = vector.shape_cast %179 : vector<2x32xf32> to vector<2x1x32xf32>
    %c0_55 = arith.constant 0 : index
    %c6 = arith.constant 6 : index
    %c0_56 = arith.constant 0 : index
    %181 = vector.load %arg18[%c0_55, %c6, %c0_56] : memref<2x8x32xf32, #tpu.memory_space<vmem>>, vector<2x1x32xf32>
    tpu.vector_store %arg18[%c0_55, %c6, %c0_56], %180 {strides = array<i32>} : memref<2x8x32xf32, #tpu.memory_space<vmem>>, vector<2x1x32xf32>,
    %cst_57 = arith.constant dense<0.000000e+00> : vector<2x64xf32>
    %182 = tpu.matmul %179, %0, %cst_57 {dimension_numbers = #tpu.dot_dimension_numbers<[1], [0], [0], [1], [0, 0, 1, 1], [], []>} : vector<2x32xf32>, vector<32x64xf32>, vector<2x64xf32> -> vector<2x64xf32>
    %cst_58 = arith.constant dense<0.000000e+00> : vector<2x32xf32>
    %183 = tpu.matmul %179, %1, %cst_58 {dimension_numbers = #tpu.dot_dimension_numbers<[1], [0], [0], [1], [0, 0, 1, 1], [], []>} : vector<2x32xf32>, vector<32x32xf32>, vector<2x32xf32> -> vector<2x32xf32>
    %184 = arith.addf %183, %4 : vector<2x32xf32>
    %185 = vector.extract_strided_slice %12 {offsets = [0, 7, 0], sizes = [2, 1, 64], strides = [1, 1, 1]} : vector<2x8x64xf32> to vector<2x1x64xf32>
    %186 = vector.shape_cast %185 : vector<2x1x64xf32> to vector<2x64xf32>
    %187 = arith.addf %186, %182 : vector<2x64xf32>
    %188 = arith.negf %187 : vector<2x64xf32>
    %189 = math.exp %188 : vector<2x64xf32>
    %cst_59 = arith.constant 1.000000e+00 : f32
    %190 = vector.broadcast %cst_59 : f32 to vector<2x64xf32>
    %191 = arith.addf %190, %189 : vector<2x64xf32>
    %192 = arith.divf %190, %191 : vector<2x64xf32>
    %193 = vector.extract_strided_slice %192 {offsets = [0, 0], sizes = [2, 32], strides = [1, 1]} : vector<2x64xf32> to vector<2x32xf32>
    %194 = vector.extract_strided_slice %192 {offsets = [0, 32], sizes = [2, 32], strides = [1, 1]} : vector<2x64xf32> to vector<2x32xf32>
    %195 = vector.extract_strided_slice %18 {offsets = [0, 7, 0], sizes = [2, 1, 32], strides = [1, 1, 1]} : vector<2x8x32xf32> to vector<2x1x32xf32>
    %196 = vector.shape_cast %195 : vector<2x1x32xf32> to vector<2x32xf32>
    %197 = arith.mulf %193, %184 : vector<2x32xf32>
    %198 = arith.addf %196, %197 : vector<2x32xf32>
    %199 = math.tanh %198 : vector<2x32xf32>
    %200 = arith.subf %179, %199 : vector<2x32xf32>
    %201 = arith.mulf %194, %200 : vector<2x32xf32>
    %202 = arith.addf %199, %201 : vector<2x32xf32>
    %203 = vector.shape_cast %202 : vector<2x32xf32> to vector<2x1x32xf32>
    %c0_60 = arith.constant 0 : index
    %c7 = arith.constant 7 : index
    %c0_61 = arith.constant 0 : index
    %204 = vector.load %arg18[%c0_60, %c7, %c0_61] : memref<2x8x32xf32, #tpu.memory_space<vmem>>, vector<2x1x32xf32>
    tpu.vector_store %arg18[%c0_60, %c7, %c0_61], %203 {strides = array<i32>} : memref<2x8x32xf32, #tpu.memory_space<vmem>>, vector<2x1x32xf32>,
    %c0_62 = arith.constant 0 : index
    %c0_63 = arith.constant 0 : index
    %205 = vector.load %arg17[%c0_62, %c0_63] : memref<2x32xf32, #tpu.memory_space<vmem>>, vector<2x32xf32>
    tpu.vector_store %arg17[%c0_62, %c0_63], %202 {strides = array<i32>} : memref<2x32xf32, #tpu.memory_space<vmem>>, vector<2x32xf32>,
    %c0_64 = arith.constant 0 : index
    %c0_65 = arith.constant 0 : index
    %c0_66 = arith.constant 0 : index
    %206 = vector.load %arg18[%c0_64, %c0_65, %c0_66] : memref<2x8x32xf32, #tpu.memory_space<vmem>>, vector<2x8x32xf32>
    %207 = vector.shape_cast %206 : vector<2x8x32xf32> to vector<16x32xf32>
    %c0_67 = arith.constant 0 : index
    %c0_68 = arith.constant 0 : index
    %208 = vector.load %arg10[%c0_67, %c0_68] : memref<32x32xf32, #tpu.memory_space<vmem>>, vector<32x32xf32>
    %cst_69 = arith.constant dense<0.000000e+00> : vector<16x32xf32>
    %209 = tpu.matmul %207, %208, %cst_69 {dimension_numbers = #tpu.dot_dimension_numbers<[1], [0], [0], [1], [0, 0, 1, 1], [], []>} : vector<16x32xf32>, vector<32x32xf32>, vector<16x32xf32> -> vector<16x32xf32>
    %210 = vector.shape_cast %209 : vector<16x32xf32> to vector<2x8x32xf32>
    %211 = vector.shape_cast %20 : vector<2x32xf32> to vector<2x1x32xf32>
    %212 = vector.broadcast %211 : vector<2x1x32xf32> to vector<2x8x32xf32>
    %213 = arith.addf %210, %212 : vector<2x8x32xf32>
    %214 = math.tanh %213 : vector<2x8x32xf32>
    %c0_70 = arith.constant 0 : index
    %c0_71 = arith.constant 0 : index
    %215 = vector.load %arg12[%c0_70, %c0_71] : memref<1x32xf32, #tpu.memory_space<vmem>>, vector<1x32xf32>
    %216 = vector.shape_cast %215 : vector<1x32xf32> to vector<1x1x32xf32>
    %217 = vector.broadcast %216 : vector<1x1x32xf32> to vector<2x8x32xf32>
    %218 = arith.mulf %214, %217 : vector<2x8x32xf32>
    %cst_72 = arith.constant dense<0.000000e+00> : vector<2x8xf32>
    %219 = vector.multi_reduction <add>, %218, %cst_72 [2] : vector<2x8x32xf32> to vector<2x8xf32>
    %cst_73 = arith.constant dense<0xFF800000> : vector<2xf32>
    %220 = vector.multi_reduction <maximumf>, %219, %cst_73 [1] : vector<2x8xf32> to vector<2xf32>
    %221 = vector.shape_cast %220 : vector<2xf32> to vector<2x1xf32>
    %222 = vector.broadcast %221 : vector<2x1xf32> to vector<2x8xf32>
    %223 = arith.subf %219, %222 : vector<2x8xf32>
    %224 = math.exp %223 : vector<2x8xf32>
    %cst_74 = arith.constant dense<0.000000e+00> : vector<2xf32>
    %225 = vector.multi_reduction <add>, %224, %cst_74 [1] : vector<2x8xf32> to vector<2xf32>
    %226 = vector.shape_cast %225 : vector<2xf32> to vector<2x1xf32>
    %227 = vector.broadcast %226 : vector<2x1xf32> to vector<2x8xf32>
    %228 = arith.divf %224, %227 : vector<2x8xf32>
    %229 = vector.shape_cast %228 : vector<2x8xf32> to vector<2x8x1xf32>
    %c0_75 = arith.constant 0 : index
    %c0_76 = arith.constant 0 : index
    %c0_77 = arith.constant 0 : index
    %230 = vector.load %arg2[%c0_75, %c0_76, %c0_77] : memref<2x8x32xf32, #tpu.memory_space<vmem>>, vector<2x8x32xf32>
    %231 = vector.broadcast %229 : vector<2x8x1xf32> to vector<2x8x32xf32>
    %232 = arith.mulf %231, %230 : vector<2x8x32xf32>
    %cst_78 = arith.constant dense<0.000000e+00> : vector<2x32xf32>
    %233 = vector.multi_reduction <add>, %232, %cst_78 [1] : vector<2x8x32xf32> to vector<2x32xf32>
    %c0_79 = arith.constant 0 : index
    %c0_80 = arith.constant 0 : index
    %234 = vector.load %arg13[%c0_79, %c0_80] : memref<32x15xf32, #tpu.memory_space<vmem>>, vector<32x15xf32>
    %cst_81 = arith.constant dense<0.000000e+00> : vector<2x15xf32>
    %235 = tpu.matmul %233, %234, %cst_81 {dimension_numbers = #tpu.dot_dimension_numbers<[1], [0], [0], [1], [0, 0, 1, 1], [], []>} : vector<2x32xf32>, vector<32x15xf32>, vector<2x15xf32> -> vector<2x15xf32>
    %c0_82 = arith.constant 0 : index
    %c0_83 = arith.constant 0 : index
    %236 = vector.load %arg14[%c0_82, %c0_83] : memref<32x15xf32, #tpu.memory_space<vmem>>, vector<32x15xf32>
    %cst_84 = arith.constant dense<0.000000e+00> : vector<2x15xf32>
    %237 = tpu.matmul %202, %236, %cst_84 {dimension_numbers = #tpu.dot_dimension_numbers<[1], [0], [0], [1], [0, 0, 1, 1], [], []>} : vector<2x32xf32>, vector<32x15xf32>, vector<2x15xf32> -> vector<2x15xf32>
    %238 = arith.addf %235, %237 : vector<2x15xf32>
    %c0_85 = arith.constant 0 : index
    %c0_86 = arith.constant 0 : index
    %239 = vector.load %arg15[%c0_85, %c0_86] : memref<1x15xf32, #tpu.memory_space<vmem>>, vector<1x15xf32>
    %240 = vector.broadcast %239 : vector<1x15xf32> to vector<2x15xf32>
    %241 = arith.addf %238, %240 : vector<2x15xf32>
    %c0_87 = arith.constant 0 : index
    %c0_88 = arith.constant 0 : index
    %242 = vector.load %arg16[%c0_87, %c0_88] : memref<2x15xf32, #tpu.memory_space<vmem>>, vector<2x15xf32>
    tpu.vector_store %arg16[%c0_87, %c0_88], %241 {strides = array<i32>} : memref<2x15xf32, #tpu.memory_space<vmem>>, vector<2x15xf32>,
    return
  }
}

</mosaic_0001>

<bundles_post_ra>
// kernel: gru_rnn_forward.1
= control target key start
LH: loop header
LB: loop body
LE: loop exit
PB: predicated region body
PF: predicated region fallthrough
CT: control target
= control target key end

     0   :  { %s4314_s0 = inlined_call_operand.vmem [shape: f32[16,300], index: 0, kind: input, shape index: {}]   ;;  %s4315_s1 = inlined_call_operand.vmem [shape: f32[2,32], index: 1, kind: input, shape index: {}]   ;;  %s4316_s2 = inlined_call_operand.vmem [shape: f32[2,8,32], index: 2, kind: input, shape index: {}]   ;;  %s4317_s3 = inlined_call_operand.vmem [shape: f32[300,64], index: 3, kind: input, shape index: {}]   ;;  %s4318_s4 = inlined_call_operand.vmem [shape: f32[300,32], index: 4, kind: input, shape index: {}]   ;;  %s4319_s5 = inlined_call_operand.vmem [shape: f32[1,64], index: 5, kind: input, shape index: {}]   ;;  %s4320_s6 = inlined_call_operand.vmem [shape: f32[1,32], index: 6, kind: input, shape index: {}]   ;;  %s4321_s7 = inlined_call_operand.vmem [shape: f32[1,32], index: 7, kind: input, shape index: {}]   ;;  %s4322_s8 = inlined_call_operand.vmem [shape: f32[32,64], index: 8, kind: input, shape index: {}]   ;;  %s4323_s9 = inlined_call_operand.vmem [shape: f32[32,32], index: 9, kind: input, shape index: {}]   ;;  %s4324_s10 = inlined_call_operand.vmem [shape: f32[32,32], index: 10, kind: input, shape index: {}]   ;;  %s4325_s11 = inlined_call_operand.vmem [shape: f32[32,32], index: 11, kind: input, shape index: {}]   ;;  %s4326_s12 = inlined_call_operand.vmem [shape: f32[1,32], index: 12, kind: input, shape index: {}]   ;;  %s4327_s13 = inlined_call_operand.vmem [shape: f32[32,15], index: 13, kind: input, shape index: {}]   ;;  %s4328_s14 = inlined_call_operand.vmem [shape: f32[32,15], index: 14, kind: input, shape index: {}]   ;;  %s4329_s15 = inlined_call_operand.vmem [shape: f32[1,15], index: 15, kind: input, shape index: {}]   ;;  %s4330_s16 = inlined_call_operand.vmem [shape: f32[2,15], index: 16, kind: output, shape index: {0}]   ;;  %s4331_s17 = inlined_call_operand.hbm [shape: f32[2,32], index: 17, kind: output, shape index: {1}]   ;;  %s4332_s18 = inlined_call_operand.hbm [shape: f32[2,8,32], index: 18, kind: output, shape index: {2}]  }
   0x1   :  { %4335 = sst [smem:[#allocation8_spill]] %s4314_s0 }
   0x2   :  { %4336 = sst [smem:[#allocation9_spill]] %s4315_s1 }
   0x3   :  { %4337 = sst [smem:[#allocation10_spill]] %s4316_s2 }
   0x4   :  { %24 = vsyncpa [#allocation3], 0  ;;  %v96_v0 = vld [vmem:[%s4317_s3 + $0x80] sm:$0xff]  ;;  %v97_v1 = vld [vmem:[%s4317_s3 + $0x88] sm:$0xff]  ;;  %vm132_vm0 = vcmask 1043456   ;;  %vm125_vm1 = vcmask 359424  }
   0x5   :  { %v112_v2 = vld [vmem:[%s4317_s3 + $0x100] sm:$0xff]  ;;  %v3164_v3 = vpack.c.bf16 %v97_v1, %v96_v0  ;;  %v113_v4 = vld [vmem:[%s4317_s3 + $0x108] sm:$0xff]  ;;  %v98_v9 = vld [vmem:[%s4317_s3 + $0x90] sm:$0xff]  ;;  %s4338_s21 = sld [smem:[#allocation8_spill]]  ;;  %vm3548_vm2 = vmmov 1  }
   0x6   :  { %v80_v5 = vld [vmem:[%s4317_s3] sm:$0xff]  ;;  %v81_v6 = vld [vmem:[%s4317_s3 + $0x8] sm:$0xff]  ;;  %v3196_v7 = vpack.c.bf16 %v113_v4, %v112_v2  ;;  %v99_v10 = vld [vmem:[%s4317_s3 + $0x98] sm:$0xff] }
   0x7   :  { %v3166_v8 = vpack.c.bf16 %v81_v6, %v80_v5  ;;  %v114_v11 = vld [vmem:[%s4317_s3 + $0x110] sm:$0xff]  ;;  %3165 = vmatprep.subr.bf16.mxu0 %v3164_v3  ;;  %v3168_v12 = vpack.c.bf16 %v99_v10, %v98_v9  ;;  %v115_v13 = vld [vmem:[%s4317_s3 + $0x118] sm:$0xff]  ;;  %v100_v18 = vld [vmem:[%s4317_s3 + $0xa0] sm:$0xff] }
   0x8   :  { %v82_v14 = vld [vmem:[%s4317_s3 + $0x10] sm:$0xff]  ;;  %v83_v15 = vld [vmem:[%s4317_s3 + $0x18] sm:$0xff]  ;;  %3197 = vmatprep.subr.bf16.mxu1 %v3196_v7  ;;  %v3200_v16 = vpack.c.bf16 %v115_v13, %v114_v11  ;;  %v101_v19 = vld [vmem:[%s4317_s3 + $0xa8] sm:$0xff] }
   0x9   :  { %3167 = vmatpush3.bf16.msra.mxu0 %v3166_v8  ;;  %v3170_v17 = vpack.c.bf16 %v83_v15, %v82_v14  ;;  %v116_v20 = vld [vmem:[%s4317_s3 + $0x120] sm:$0xff]  ;;  %3199 = vmatpush3.bf16.msra.mxu1 %v3196_v7  ;;  %v3172_v21 = vpack.c.bf16 %v101_v19, %v100_v18  ;;  %v117_v22 = vld [vmem:[%s4317_s3 + $0x128] sm:$0xf]  ;;  %v102_v27 = vld [vmem:[%s4317_s3 + $0xb0] sm:$0xff] }
   0xa   :  { %3169 = vmatprep.subr.bf16.mxu0 %v3168_v12  ;;  %v84_v23 = vld [vmem:[%s4317_s3 + $0x20] sm:$0xff]  ;;  %3201 = vmatprep.subr.bf16.mxu1 %v3200_v16  ;;  %v3204_v24 = vpack.c.bf16 %v117_v22, %v116_v20  ;;  %v85_v25 = vld [vmem:[%s4317_s3 + $0x28] sm:$0xff]  ;;  %vm3718_vm3 = vmpackc.low %vm132_vm0, %vm3548_vm2 }
   0xb   :  { %v3712_v26 = vld [vmem:[%s4338_s21 + $0x10] sm:$0xff]  ;;  %v103_v29 = vld [vmem:[%s4317_s3 + $0xb8] sm:$0xff]  ;;  %v302_v30 = vld [vmem:[%s4318_s4 + $0x80] sm:$0xff]  ;;  %v3174_v31 = vpack.c.bf16 %v85_v25, %v84_v23 }
   0xc   :  { %2926 = vmatprep.mubr.msk.f32.mxu1 %vm125_vm1, %v3712_v26  ;;  %v303_v32 = vld [vmem:[%s4318_s4 + $0x88] sm:$0xff]  ;;  %v3176_v33 = vpack.c.bf16 %v103_v29, %v102_v27  ;;  %v86_v34 = vld [vmem:[%s4317_s3 + $0x30] sm:$0xff]  ;;  %v87_v35 = vld [vmem:[%s4317_s3 + $0x38] sm:$0xff] }
   0xd   :  { %3171 = vmatpush3.bf16.msra.mxu0 %v3170_v17  ;;  %3203 = vmatpush3.bf16.msra.mxu1 %v3200_v16  ;;  %v286_v36 = vld [vmem:[%s4318_s4] sm:$0xff]  ;;  %v3210_v37 = vpack.c.bf16 %v303_v32, %v302_v30  ;;  %v287_v38 = vld [vmem:[%s4318_s4 + $0x8] sm:$0xff]  ;;  %v304_v41 = vld [vmem:[%s4318_s4 + $0x90] sm:$0xff]  ;;  %v3178_v44 = vpack.c.bf16 %v87_v35, %v86_v34 }
   0xe   :  { %3173 = vmatprep.subr.bf16.mxu0 %v3172_v21  ;;  %3206 = vmatprep.subr.msk.bf16.mxu1 %vm3718_vm3, %v3204_v24  ;;  %v104_v39 = vld [vmem:[%s4317_s3 + $0xc0] sm:$0xff]  ;;  %v105_v40 = vld [vmem:[%s4317_s3 + $0xc8] sm:$0xff]  ;;  %v305_v42 = vld [vmem:[%s4318_s4 + $0x98] sm:$0xff]  ;;  %v3212_v45 = vpack.c.bf16 %v287_v38, %v286_v36 }
   0xf   :  { %v3762_v43 = vld [vmem:[%s4338_s21 + $0x28] sm:$0xff]  ;;  %v3180_v46 = vpack.c.bf16 %v105_v40, %v104_v39  ;;  %v88_v47 = vld [vmem:[%s4317_s3 + $0x40] sm:$0xff]  ;;  %v288_v49 = vld [vmem:[%s4318_s4 + $0x10] sm:$0xff]  ;;  %v3214_v50 = vpack.c.bf16 %v305_v42, %v304_v41 }
  0x10   :  { %v89_v48 = vld [vmem:[%s4317_s3 + $0x48] sm:$0xff]  ;;  %v289_v51 = vld [vmem:[%s4318_s4 + $0x18] sm:$0xff]  ;;  %v106_v52 = vld [vmem:[%s4317_s3 + $0xd0] sm:$0xff] }
  0x11   :  { %3175 = vmatpush3.bf16.msra.mxu0 %v3174_v31  ;;  %3209 = vmatpush3.bf16.msk.msra.mxu1 %vm3718_vm3, %v3204_v24  ;;  %v107_v53 = vld [vmem:[%s4317_s3 + $0xd8] sm:$0xff]  ;;  %v306_v54 = vld [vmem:[%s4318_s4 + $0xa0] sm:$0xff]  ;;  %v307_v55 = vld [vmem:[%s4318_s4 + $0xa8] sm:$0xff]  ;;  %v3182_v56 = vpack.c.bf16 %v89_v48, %v88_v47  ;;  %v3216_v57 = vpack.c.bf16 %v289_v51, %v288_v49 }
  0x12   :  { %3177 = vmatprep.subr.bf16.mxu0 %v3176_v33  ;;  %3211 = vmatprep.subr.bf16.mxu1 %v3210_v37  ;;  %v3184_v58 = vpack.c.bf16 %v107_v53, %v106_v52  ;;  %v90_v59 = vld [vmem:[%s4317_s3 + $0x50] sm:$0xff]  ;;  %v91_v60 = vld [vmem:[%s4317_s3 + $0x58] sm:$0xff]  ;;  %v290_v61 = vld [vmem:[%s4318_s4 + $0x20] sm:$0xff]  ;;  %v3218_v62 = vpack.c.bf16 %v307_v55, %v306_v54 }
  0x13   :  { %v291_v63 = vld [vmem:[%s4318_s4 + $0x28] sm:$0xff]  ;;  %v108_v0 = vld [vmem:[%s4317_s3 + $0xe0] sm:$0xff]  ;;  %v308_v2 = vld [vmem:[%s4318_s4 + $0xb0] sm:$0xff]  ;;  %v3186_v4 = vpack.c.bf16 %v91_v60, %v90_v59 }
  0x14   :  { %2927 = vmatmul.mubr.msk.f32.vlgmr.msra.gmra.mrb[0].mxu1 %vm125_vm1, %v3762_v43  ;;  %v109_v1 = vld [vmem:[%s4317_s3 + $0xe8] sm:$0xff]  ;;  %v309_v3 = vld [vmem:[%s4318_s4 + $0xb8] sm:$0xff]  ;;  %v3220_v6 = vpack.c.bf16 %v291_v63, %v290_v61  ;;  %v92_v8 = vld [vmem:[%s4317_s3 + $0x60] sm:$0xff] }
  0x15   :  { %3179 = vmatpush3.bf16.msra.mxu0 %v3178_v44  ;;  %3213 = vmatpush3.bf16.msra.mxu1 %v3212_v45  ;;  %v75_v5 = vld [vmem:[%s4338_s21 + $0x8] sm:$0xff]  ;;  %v3188_v7 = vpack.c.bf16 %v109_v1, %v108_v0  ;;  %v292_v10 = vld [vmem:[%s4318_s4 + $0x30] sm:$0xff]  ;;  %v3222_v11 = vpack.c.bf16 %v309_v3, %v308_v2  ;;  %v293_v12 = vld [vmem:[%s4318_s4 + $0x38] sm:$0xff] }
  0x16   :  { %3181 = vmatprep.subr.bf16.mxu0 %v3180_v46  ;;  %3215 = vmatprep.subr.bf16.mxu1 %v3214_v50  ;;  %v93_v9 = vld [vmem:[%s4317_s3 + $0x68] sm:$0xff]  ;;  %v110_v13 = vld [vmem:[%s4317_s3 + $0xf0] sm:$0xff]  ;;  %v111_v14 = vld [vmem:[%s4317_s3 + $0xf8] sm:$0xff]  ;;  %v3224_v18 = vpack.c.bf16 %v293_v12, %v292_v10 }
  0x17   :  { %200 = vmatprep.mubr.f32.mxu0 %v75_v5  ;;  %v310_v15 = vld [vmem:[%s4318_s4 + $0xc0] sm:$0xff]  ;;  %v311_v16 = vld [vmem:[%s4318_s4 + $0xc8] sm:$0xff]  ;;  %398 = vmatprep.mubr.f32.mxu1 %v75_v5  ;;  %v3190_v17 = vpack.c.bf16 %v93_v9, %v92_v8  ;;  %v3192_v19 = vpack.c.bf16 %v111_v14, %v110_v13  ;;  %v94_v20 = vld [vmem:[%s4317_s3 + $0x70] sm:$0xff] }
  0x18   :  { %v95_v21 = vld [vmem:[%s4317_s3 + $0x78] sm:$0xff]  ;;  %v294_v22 = vld [vmem:[%s4318_s4 + $0x40] sm:$0xff]  ;;  %v3226_v23 = vpack.c.bf16 %v311_v16, %v310_v15  ;;  %v295_v24 = vld [vmem:[%s4318_s4 + $0x48] sm:$0xff] }
  0x19   :  { %3183 = vmatpush3.bf16.msra.mxu0 %v3182_v56  ;;  %3217 = vmatpush3.bf16.msra.mxu1 %v3216_v57  ;;  %v318_v25 = vld [vmem:[%s4318_s4 + $0x100] sm:$0xff]  ;;  %v319_v27 = vld [vmem:[%s4318_s4 + $0x108] sm:$0xff]  ;;  %v312_v29 = vld [vmem:[%s4318_s4 + $0xd0] sm:$0xff]  ;;  %v3194_v31 = vpack.c.bf16 %v95_v21, %v94_v20  ;;  %v3228_v32 = vpack.c.bf16 %v295_v24, %v294_v22 }
  0x1a   :  { %3185 = vmatprep.subr.bf16.mxu0 %v3184_v58  ;;  %3219 = vmatprep.subr.bf16.mxu1 %v3218_v62  ;;  %v313_v30 = vld [vmem:[%s4318_s4 + $0xd8] sm:$0xff]  ;;  %v296_v33 = vld [vmem:[%s4318_s4 + $0x50] sm:$0xff]  ;;  %v3242_v34 = vpack.c.bf16 %v319_v27, %v318_v25  ;;  %v314_v39 = vld [vmem:[%s4318_s4 + $0xe0] sm:$0xff] }
  0x1b   :  { %v3230_v35 = vpack.c.bf16 %v313_v30, %v312_v29  ;;  %v297_v36 = vld [vmem:[%s4318_s4 + $0x58] sm:$0xff]  ;;  %v320_v37 = vld [vmem:[%s4318_s4 + $0x110] sm:$0xff]  ;;  %v315_v40 = vld [vmem:[%s4318_s4 + $0xe8] sm:$0xff] }
  0x1c   :  { %v321_v38 = vld [vmem:[%s4318_s4 + $0x118] sm:$0xff]  ;;  %v74_v41 = vld [vmem:[%s4338_s21] sm:$0xff] }
  0x1d   :  { %3187 = vmatpush3.bf16.msra.mxu0 %v3186_v4  ;;  %3221 = vmatpush3.bf16.msra.mxu1 %v3220_v6 }
  0x1e   :  { %3189 = vmatprep.subr.bf16.mxu0 %v3188_v7  ;;  %3223 = vmatprep.subr.bf16.mxu1 %v3222_v11 }
  0x21   :  { %3191 = vmatpush3.bf16.msra.mxu0 %v3190_v17  ;;  %3225 = vmatpush3.bf16.msra.mxu1 %v3224_v18 }
  0x22   :  { %3193 = vmatprep.subr.bf16.mxu0 %v3192_v19  ;;  %3227 = vmatprep.subr.bf16.mxu1 %v3226_v23 }
  0x25   :  { %3195 = vmatpush3.bf16.msra.mxu0 %v3194_v31 }
  0x26   :  { %25 = vsyncpa [#allocation5], 0  ;;  %3229 = vmatpush3.bf16.msra.mxu1 %v3228_v32  ;;  %v3232_v42 = vpack.c.bf16 %v297_v36, %v296_v33  ;;  %v78_v44 = vld [vmem:[%s4338_s21 + $0x20] sm:$0xff]  ;;  %3243 = vmatprep.subr.bf16.mxu0 %v3242_v34  ;;  %v3246_v46 = vpack.c.bf16 %v321_v38, %v320_v37  ;;  %v3234_v47 = vpack.c.bf16 %v315_v40, %v314_v39  ;;  %v299_v48 = vld [vmem:[%s4318_s4 + $0x68] sm:$0xff]  ;;  %v3549_v1 = vmov 0.0|0.0   ;;  %s4341_s20 = sld [smem:[#allocation9_spill]] }
  0x27   :  { %v298_v45 = vld [vmem:[%s4318_s4 + $0x60] sm:$0xff]  ;;  %3231 = vmatprep.subr.bf16.mxu1 %v3230_v35  ;;  %v323_v50 = vld [vmem:[%s4318_s4 + $0x128] sm:$0xf]  ;;  %v316_v51 = vld [vmem:[%s4318_s4 + $0xf0] sm:$0xff]  ;;  %vm3550_vm4 = vmmov 0   ;;  %vm488_vm5 = vcmask 261120  }
  0x28   :  { %v322_v49 = vld [vmem:[%s4318_s4 + $0x120] sm:$0xff]  ;;  %201 = vmatmul.mubr.f32.vlgmr.msra.gmra.mrb[0].mxu0 %v74_v41  ;;  %v317_v52 = vld [vmem:[%s4318_s4 + $0xf8] sm:$0xff]  ;;  %v3236_v54 = vpack.c.bf16 %v299_v48, %v298_v45  ;;  %v300_v57 = vld [vmem:[%s4318_s4 + $0x70] sm:$0xff]  ;;  %vm733_vm6 = vcmask 1041409   ;;  %s3553_s26 = smov 96   ;;  %vm757_vm7 = vcmask 253952  }
  0x29   :  { %205 = vmatprep.mubr.f32.mxu0 %v78_v44  ;;  %v77_v53 = vld [vmem:[%s4338_s21 + $0x18] sm:$0xff]  ;;  %3245 = vmatpush3.bf16.msra.mxu0 %v3242_v34  ;;  %v3250_v55 = vpack.c.bf16 %v323_v50, %v322_v49  ;;  %v3238_v56 = vpack.c.bf16 %v317_v52, %v316_v51  ;;  %v484_v60 = vld [vmem:[%s4325_s11] sm:$0xff]  ;;  %v485_v61 = vld [vmem:[%s4325_s11 + $0x8] sm:$0xff]  ;;  %vm964_vm8 = vcmask 254977   ;;  %vm1173_vm9 = vcmask 256002   ;;  %s4342_s29 = sld [smem:[#allocation10_spill]] }
  0x2a   :  { %3233 = vmatpush3.bf16.msra.mxu1 %v3232_v42  ;;  %3247 = vmatprep.subr.bf16.mxu0 %v3246_v46  ;;  %v301_v58 = vld [vmem:[%s4318_s4 + $0x78] sm:$0xff]  ;;  %v58_v62 = vld [vmem:[%s4322_s8] sm:$0xff]  ;;  %v3257_v63 = vpack.c.bf16 %v485_v61, %v484_v60  ;;  %v486_v2 = vld [vmem:[%s4325_s11 + $0x10] sm:$0xff]  ;;  %vm1383_vm10 = vcmask 257027   ;;  %vm1593_vm11 = vcmask 258052   ;;  %vm1803_vm12 = vcmask 259077  }
  0x2b   :  { %3235 = vmatprep.subr.bf16.mxu1 %v3234_v47  ;;  %v3240_v59 = vpack.c.bf16 %v301_v58, %v300_v57  ;;  %v487_v3 = vld [vmem:[%s4325_s11 + $0x18] sm:$0xff]  ;;  %v60_v28 = vld [vmem:[%s4322_s8 + $0x10] sm:$0xff]  ;;  %v62_v7 = vld [vmem:[%s4323_s9] sm:$0xff]  ;;  %vm2013_vm13 = vcmask 260102   ;;  %vm2223_vm14 = vcmask 261127   ;;  %vm2386_vm15 = vcmask 58368  }
  0x2c   :  { %206 = vmatmul.mubr.f32.gmra.mrb[2].mxu0 %v77_v53  ;;  %v61_v4 = vld [vmem:[%s4322_s8 + $0x18] sm:$0xff]  ;;  %v3260_v5 = vpack.c.bf16 %v487_v3, %v486_v2  ;;  %v63_v8 = vld [vmem:[%s4323_s9 + $0x8] sm:$0xff]  ;;  %v3975_v10 = vld [vmem:[%s4341_s20] sm:$0x3]  ;;  %s3557_s21 = smov [#allocation4]  }
  0x2d   :  { %3249 = vmatpush3.bf16.msra.mxu0 %v3246_v46  ;;  %2941 = vmatprep.mubr.msk.f32.mxu0 %vm125_vm1, %v3712_v26  ;;  %v59_v26 = vld [vmem:[%s4322_s8 + $0x8] sm:$0xff]  ;;  %v3955_v6 = vpack.c.bf16 %v61_v4, %v60_v28  ;;  %v3967_v9 = vpack.c.bf16 %v63_v8, %v62_v7  ;;  %v64_v11 = vld [vmem:[%s4323_s9 + $0x10] sm:$0xff]  ;;  %v65_v12 = vld [vmem:[%s4323_s9 + $0x18] sm:$0xff]  ;;  %s2656_s19 = sshll.u32 %s3557_s21, 4  ;;  %s4276_s19 = int_to_ptr.vmem [resolvable:$true] %s2656_s19 }
  0x2e   :  { %3237 = vmatpush3.bf16.msra.mxu1 %v3236_v54  ;;  %3252 = vmatprep.subr.msk.bf16.mxu0 %vm3718_vm3, %v3250_v55  ;;  %v3936_v0 = vpack.c.bf16 %v59_v26, %v58_v62  ;;  %v3990_v13 = vpack.c.bf16 %v65_v12, %v64_v11  ;;  %v2674_v17 = vld [vmem:[%s4319_s5] ss:$0 sm:$0xff] }
  0x2f   :  { %3239 = vmatprep.subr.bf16.mxu1 %v3238_v56  ;;  %v2678_v33 = vld [vmem:[%s4320_s6] ss:$0 sm:$0xff] }
  0x30   :  { %v4032_v58 = vld [vmem:[%s4321_s7] ss:$0 sm:$0xff]  ;;  %s3552_s7 = smov 32  }
  0x31   :  { %3255 = vmatpush3.bf16.msk.msra.mxu0 %vm3718_vm3, %v3250_v55 }
  0x32   :  { %3241 = vmatpush3.bf16.msra.mxu1 %v3240_v59  ;;  %3256 = vmatprep.subr.bf16.mxu0 %v3549_v1 }
  0x33   :  { %3262 = vmatprep.subr.bf16.mxu1 %v3549_v1 }
  0x34   :  { %2942 = vmatmul.mubr.msk.f32.vlgmr.msra.gmra.mrb[4].mxu0 %vm125_vm1, %v3762_v43  ;;  %v3551_v43 = vmov 0.0  }
  0x35   :  { %399 = vmatmul.mubr.f32.vlgmr.msra.gmra.mrb[2].mxu1 %v74_v41  ;;  %3258 = vmatpush3.bf16.msra.mxu0 %v3257_v63 }
  0x36   :  { %3264 = vmatpush3.bf16.msra.mxu1 %v3936_v0  ;;  %403 = vmatprep.mubr.f32.mxu1 %v78_v44 }
  0x37   :  { %3265 = vmatprep.subr.bf16.mxu1 %v3549_v1  ;;  %3259 = vmatprep.subr.bf16.mxu0 %v3549_v1 }
  0x38   :  { %2952 = vmatprep.mubr.msk.f32.mxu0 %vm3550_vm4, %v3551_v43 }
  0x39   :  { %404 = vmatmul.mubr.f32.gmra.mrb[4].mxu1 %v77_v53  ;;  %3261 = vmatpush3.bf16.msra.mxu0 %v3260_v5 }
  0x3a   :  { %3267 = vmatpush3.bf16.msra.mxu1 %v3955_v6  ;;  %2963 = vmatprep.mubr.msk.f32.mxu1 %vm3550_vm4, %v3551_v43 }
  0x3b   :  { %3268 = vmatprep.subr.bf16.mxu0 %v3549_v1  ;;  %3274 = vmatprep.subr.bf16.mxu1 %v3549_v1 }
  0x3c   :  { %2953 = vmatmul.mubr.msk.f32.vlgmr.msra.gmra.mrb[6].mxu0 %vm488_vm5, %v3975_v10 }
  0x3d   :  { %2964 = vmatmul.mubr.msk.f32.vlgmr.msra.gmra.mrb[6].mxu1 %vm488_vm5, %v3975_v10  ;;  %3270 = vmatpush3.bf16.msra.mxu0 %v3967_v9 }
  0x3e   :  { %3271 = vmatprep.subr.bf16.mxu0 %v3549_v1  ;;  %2974 = vmatprep.mubr.msk.f32.mxu0 %vm3550_vm4, %v3551_v43 }
  0x3f   :  { %3276 = vmatpush3.bf16.msra.mxu1 %v3936_v0  ;;  %2985 = vmatprep.mubr.msk.f32.mxu1 %vm3550_vm4, %v3551_v43 }
  0x40   :  { %3277 = vmatprep.subr.bf16.mxu1 %v3549_v1 }
  0x41   :  { %3273 = vmatpush3.bf16.msra.mxu0 %v3990_v13 }
  0x42   :  { %3280 = vmatprep.subr.bf16.mxu0 %v3549_v1 }
  0x43   :  { %3279 = vmatpush3.bf16.msra.mxu1 %v3955_v6 }
  0x44   :  { %2975 = vmatmul.mubr.msk.f32.vlgmr.msra.gmra.mrb[8].mxu0 %vm488_vm5, %v3975_v10  ;;  %3286 = vmatprep.subr.bf16.mxu1 %v3549_v1 }
  0x45   :  { %3282 = vmatpush3.bf16.msra.mxu0 %v3967_v9  ;;  %2996 = vmatprep.mubr.msk.f32.mxu0 %vm3550_vm4, %v3551_v43 }
  0x46   :  { %3283 = vmatprep.subr.bf16.mxu0 %v3549_v1 }
  0x49   :  { %3285 = vmatpush3.bf16.msra.mxu0 %v3990_v13 }
  0x4a   :  { %3292 = vmatprep.subr.bf16.mxu0 %v3549_v1 }
  0xe7   :  { %v2928_v14 = vpop.f32.mrb[0].mxu1 }
  0xe8   :  { %v277_v15 = vpop.f32.mrb[1].mxu1 }
  0xfb   :  { %v2753_v16 = vpop.f32.mrb[0].mxu0 }
  0xfc   :  { %v2754_v18 = vpop.f32.mrb[1].mxu0 }
  0xfd   :  { %v2755_v19 = vadd.f32 %v2754_v18, %v2753_v16 }
  0xff   :  { %v203_v20 = vadd.f32 %v2755_v19, %v2674_v17  ;;  %v2756_v21 = vpop.f32.mrb[2].mxu0 }
 0x100   :  { %v2757_v22 = vpop.f32.mrb[3].mxu0 }
 0x101   :  { %v4014_v23 = vadd.f32 %v277_v15, %v203_v20  ;;  %v2758_v24 = vadd.f32 %v2757_v22, %v2756_v21 }
 0x103   :  { %v208_v25 = vadd.f32 %v2758_v24, %v2674_v17 }
 0x105   :  { %v4016_v27 = vadd.f32 %v2928_v14, %v208_v25 }
 0x107   :  { %v2943_v29 = vpop.f32.mrb[4].mxu0 }
 0x108   :  { %v2799_v30 = vpop.f32.mrb[2].mxu1  ;;  %v475_v31 = vpop.f32.mrb[5].mxu0 }
 0x109   :  { %v2800_v32 = vpop.f32.mrb[3].mxu1 }
 0x10a   :  { %v2801_v34 = vadd.f32 %v2800_v32, %v2799_v30 }
 0x10c   :  { %v2802_v35 = vpop.f32.mrb[4].mxu1  ;;  %v401_v36 = vadd.f32 %v2801_v34, %v2678_v33 }
 0x10d   :  { %v2803_v37 = vpop.f32.mrb[5].mxu1 }
 0x10e   :  { %v2804_v38 = vadd.f32 %v2803_v37, %v2802_v35  ;;  %v4021_v39 = vadd.f32 %v475_v31, %v401_v36 }
 0x10f   :  { %v4023_v40 = vpop.f32.mrb[6].mxu0 }
 0x110   :  { %v406_v41 = vadd.f32 %v2804_v38, %v2678_v33  ;;  %v628_v42 = vpop.f32.mrb[6].mxu1  ;;  %v2954_v44 = vpop.f32.mrb[7].mxu0 }
 0x111   :  { %v703_v45 = vrot.slane %v628_v42, 1  ;;  %v706_v46 = vadd.f32 %v628_v42, %v4014_v23  ;;  %v2965_v47 = vpop.f32.mrb[7].mxu1 }
 0x112   :  { %v4026_v48 = vadd.f32 %v2943_v29, %v406_v41 }
 0x113   :  { %v707_v49 = vadd.f32 %v703_v45, %v4016_v27  ;;  %v2685_v50 = vmul.f32 -1.442695, %v706_v46 }
 0x115   :  { %3392 = vpow2.f32 %v2685_v50  ;;  %v2686_v51 = vmul.f32 -1.442695, %v707_v49 }
 0x117   :  { %3394 = vpow2.f32 %v2686_v51  ;;  %v698_v52 = vpop.f32.mrb[8].mxu0 }
 0x118   :  { %v2976_v53 = vpop.f32.mrb[9].mxu0  ;;  %v699_v59 = vadd.f32 %v4032_v58, %v698_v52 }
 0x11a   :  { %v721_v60 = vrot.slane %v699_v59, 1 }
 0x11f   :  { %v3393_v54 = vpop.eup %3392 }
 0x120   :  { %v714_v55 = vadd.f32 1.0, %v3393_v54 }
 0x121   :  { %v3395_v56 = vpop.eup %3394 }
 0x122   :  { %v715_v57 = vadd.f32 1.0, %v3395_v56  ;;  %3396 = vrcp.f32 %v714_v55 }
 0x124   :  { %3398 = vrcp.f32 %v715_v57 }
 0x12c   :  { %v3397_v61 = vpop.eup %3396 }
 0x12d   :  { %v724_v62 = vmul.f32 %v3397_v61, %v699_v59 }
 0x12e   :  { %v3399_v26 = vpop.eup %3398 }
 0x12f   :  { %v725_v63 = vmul.f32 %v3399_v26, %v721_v60  ;;  %v726_v2 = vadd.f32 %v724_v62, %v4021_v39 }
 0x131   :  { %v727_v3 = vadd.f32 %v725_v63, %v4026_v48 }
 0x133   :  { %3400 = vtanh.f32 %v727_v3 }
 0x134   :  { %3402 = vtanh.f32 %v726_v2 }
 0x13d   :  { %v3401_v28 = vpop.eup %3400 }
 0x13e   :  { %v732_v4 = vrot.slane %v3401_v28, 7  ;;  %v3403_v5 = vpop.eup %3402 }
 0x140   :  { %v734_v7 = vsel %vm733_vm6, %v732_v4, %v3403_v5 }
 0x141   :  { %v736_v8 = vsub.f32 %v3975_v10, %v734_v7 }
 0x143   :  { %v738_v11 = vrot.slane %v736_v8, 1 }
 0x145   :  { %741 = vrot.lane.b32.xlu0 %v738_v11, %s3552_s7 }
 0x149   :  { %739 = vrot.lane.b32.xlu0 %v736_v8, %s3552_s7 }
 0x1b7   :  { %v742_v12 = vpop.permute.xlu0 %741 }
 0x1b8   :  { %v746_v14 = vmul.f32 %v3399_v26, %v742_v12 }
 0x1ba   :  { %751 = vrot.lane.b32.xlu1 %v746_v14, %s3553_s26 }
 0x1bb   :  { %v740_v15 = vpop.permute.xlu0 %739 }
 0x1bc   :  { %v745_v16 = vmul.f32 %v3397_v61, %v740_v15 }
 0x1be   :  { %749 = vrot.lane.b32.xlu1 %v745_v16, %s3553_s26 }
 0x22c   :  { %v752_v17 = vpop.permute.xlu1 %751 }
 0x22d   :  { %v756_v18 = vadd.f32 %v3401_v28, %v752_v17 }
 0x22f   :  { %759 = vst.msk [vmem:[#allocation4 + $0x8] sm:$0x1] %vm757_vm7, %v756_v18  ;;  %v762_v19 = vrot.slane %v756_v18, 7 }
 0x230   :  { %v750_v10 = vpop.permute.xlu1 %749 }
 0x231   :  { %v755_v20 = vadd.f32 %v3403_v5, %v750_v10 }
 0x233   :  { %758 = vst.msk [vmem:[#allocation4] sm:$0x1] %vm757_vm7, %v755_v20  ;;  %v763_v21 = vsel %vm733_vm6, %v762_v19, %v755_v20 }
 0x234   :  { %2986 = vmatmul.mubr.msk.f32.vlgmr.msra.gmra.mrb[8].mxu1 %vm488_vm5, %v763_v21  ;;  %2997 = vmatmul.mubr.msk.f32.vlgmr.msra.gmra.mrb[10].mxu0 %vm488_vm5, %v763_v21 }
 0x235   :  { %3288 = vmatpush3.bf16.msra.mxu1 %v3936_v0  ;;  %3294 = vmatpush3.bf16.msra.mxu0 %v3967_v9 }
 0x236   :  { %3289 = vmatprep.subr.bf16.mxu1 %v3549_v1  ;;  %3295 = vmatprep.subr.bf16.mxu0 %v3549_v1 }
 0x237   :  { %3007 = vmatprep.mubr.msk.f32.mxu1 %vm3550_vm4, %v3551_v43  ;;  %3018 = vmatprep.mubr.msk.f32.mxu0 %vm3550_vm4, %v3551_v43 }
 0x239   :  { %3291 = vmatpush3.bf16.msra.mxu1 %v3955_v6  ;;  %3297 = vmatpush3.bf16.msra.mxu0 %v3990_v13 }
 0x23a   :  { %3298 = vmatprep.subr.bf16.mxu1 %v3549_v1  ;;  %3304 = vmatprep.subr.bf16.mxu0 %v3549_v1 }
 0x307   :  { %v832_v22 = vpop.f32.mrb[8].mxu1  ;;  %v902_v24 = vpop.f32.mrb[10].mxu0 }
 0x308   :  { %v907_v25 = vrot.slane %v832_v22, 7  ;;  %v911_v29 = vadd.f32 %v832_v22, %v4016_v27  ;;  %v2987_v30 = vpop.f32.mrb[9].mxu1  ;;  %v2998_v31 = vpop.f32.mrb[11].mxu0  ;;  %v903_v41 = vadd.f32 %v4032_v58, %v902_v24 }
 0x30a   :  { %v910_v32 = vadd.f32 %v907_v25, %v4014_v23  ;;  %v2690_v33 = vmul.f32 -1.442695, %v911_v29  ;;  %v925_v44 = vrot.slane %v903_v41, 7 }
 0x30c   :  { %v2689_v34 = vmul.f32 -1.442695, %v910_v32  ;;  %3404 = vpow2.f32 %v2690_v33 }
 0x30e   :  { %3406 = vpow2.f32 %v2689_v34 }
 0x316   :  { %v3405_v35 = vpop.eup %3404 }
 0x317   :  { %v919_v36 = vadd.f32 1.0, %v3405_v35 }
 0x318   :  { %v3407_v37 = vpop.eup %3406 }
 0x319   :  { %v918_v38 = vadd.f32 1.0, %v3407_v37  ;;  %3408 = vrcp.f32 %v919_v36 }
 0x31b   :  { %3410 = vrcp.f32 %v918_v38 }
 0x323   :  { %v3409_v42 = vpop.eup %3408 }
 0x324   :  { %v929_v45 = vmul.f32 %v3409_v42, %v903_v41 }
 0x325   :  { %v3411_v46 = vpop.eup %3410 }
 0x326   :  { %v928_v47 = vmul.f32 %v3411_v46, %v925_v44  ;;  %v931_v49 = vadd.f32 %v929_v45, %v4026_v48 }
 0x328   :  { %v930_v50 = vadd.f32 %v928_v47, %v4021_v39  ;;  %3412 = vtanh.f32 %v931_v49 }
 0x32a   :  { %3414 = vtanh.f32 %v930_v50 }
 0x332   :  { %v3413_v51 = vpop.eup %3412 }
 0x333   :  { %v937_v52 = vrot.slane %v3413_v51, 1 }
 0x334   :  { %v3415_v53 = vpop.eup %3414 }
 0x335   :  { %v941_v54 = vsub.f32 %v756_v18, %v937_v52  ;;  %v936_v55 = vrot.slane %v3415_v53, 1 }
 0x337   :  { %v945_v56 = vrot.slane %v941_v54, 7  ;;  %v940_v57 = vsub.f32 %v755_v20, %v936_v55 }
 0x339   :  { %948 = vrot.lane.b32.xlu1 %v945_v56, %s3552_s7  ;;  %v944_v59 = vrot.slane %v940_v57, 7 }
 0x33b   :  { %946 = vrot.lane.b32.xlu0 %v944_v59, %s3552_s7 }
 0x3ab   :  { %v949_v60 = vpop.permute.xlu1 %948 }
 0x3ac   :  { %v953_v61 = vmul.f32 %v3409_v42, %v949_v60 }
 0x3ad   :  { %v947_v62 = vpop.permute.xlu0 %946 }
 0x3ae   :  { %v952_v26 = vmul.f32 %v3411_v46, %v947_v62  ;;  %958 = vrot.lane.b32.xlu1 %v953_v61, %s3553_s26 }
 0x3b0   :  { %956 = vrot.lane.b32.xlu0 %v952_v26, %s3553_s26 }
 0x420   :  { %v959_v63 = vpop.permute.xlu1 %958 }
 0x421   :  { %v963_v2 = vadd.f32 %v3413_v51, %v959_v63 }
 0x422   :  { %v957_v3 = vpop.permute.xlu0 %956 }
 0x423   :  { %966 = vst.msk [vmem:[#allocation4 + $0x8] sm:$0x2] %vm964_vm8, %v963_v2  ;;  %v962_v28 = vadd.f32 %v3415_v53, %v957_v3 }
 0x425   :  { %965 = vst.msk [vmem:[#allocation4] sm:$0x2] %vm964_vm8, %v962_v28  ;;  %v969_v4 = vrot.slane %v962_v28, 1 }
 0x427   :  { %v970_v5 = vsel %vm733_vm6, %v963_v2, %v969_v4 }
 0x428   :  { %3008 = vmatmul.mubr.msk.f32.vlgmr.msra.gmra.mrb[10].mxu1 %vm488_vm5, %v970_v5  ;;  %3019 = vmatmul.mubr.msk.f32.vlgmr.msra.gmra.mrb[12].mxu0 %vm488_vm5, %v970_v5 }
 0x429   :  { %3300 = vmatpush3.bf16.msra.mxu1 %v3936_v0  ;;  %3306 = vmatpush3.bf16.msra.mxu0 %v3967_v9 }
 0x42a   :  { %3301 = vmatprep.subr.bf16.mxu1 %v3549_v1  ;;  %3307 = vmatprep.subr.bf16.mxu0 %v3549_v1 }
 0x42b   :  { %3029 = vmatprep.mubr.msk.f32.mxu1 %vm3550_vm4, %v3551_v43  ;;  %3040 = vmatprep.mubr.msk.f32.mxu0 %vm3550_vm4, %v3551_v43 }
 0x42d   :  { %3303 = vmatpush3.bf16.msra.mxu1 %v3955_v6  ;;  %3309 = vmatpush3.bf16.msra.mxu0 %v3990_v13 }
 0x42e   :  { %3310 = vmatprep.subr.bf16.mxu1 %v3549_v1  ;;  %3316 = vmatprep.subr.bf16.mxu0 %v3549_v1 }
 0x4fb   :  { %v1039_v7 = vpop.f32.mrb[10].mxu1  ;;  %v1109_v8 = vpop.f32.mrb[12].mxu0 }
 0x4fc   :  { %v1114_v11 = vrot.slane %v1039_v7, 6  ;;  %v1115_v12 = vrot.slane %v1039_v7, 7  ;;  %v3009_v14 = vpop.f32.mrb[11].mxu1  ;;  %v3020_v15 = vpop.f32.mrb[13].mxu0  ;;  %v1110_v24 = vadd.f32 %v4032_v58, %v1109_v8 }
 0x4fe   :  { %v1118_v16 = vadd.f32 %v1114_v11, %v4014_v23  ;;  %v1119_v17 = vadd.f32 %v1115_v12, %v4016_v27  ;;  %v1133_v25 = vrot.slane %v1110_v24, 6  ;;  %v1134_v30 = vrot.slane %v1110_v24, 7 }
 0x500   :  { %v2693_v18 = vmul.f32 -1.442695, %v1118_v16  ;;  %v2694_v10 = vmul.f32 -1.442695, %v1119_v17 }
 0x502   :  { %3416 = vpow2.f32 %v2693_v18 }
 0x503   :  { %3418 = vpow2.f32 %v2694_v10 }
 0x50c   :  { %v3417_v19 = vpop.eup %3416 }
 0x50d   :  { %v3419_v20 = vpop.eup %3418  ;;  %v1126_v21 = vadd.f32 1.0, %v3417_v19 }
 0x50e   :  { %v1127_v22 = vadd.f32 1.0, %v3419_v20 }
 0x50f   :  { %3420 = vrcp.f32 %v1126_v21 }
 0x510   :  { %3422 = vrcp.f32 %v1127_v22 }
 0x519   :  { %v3421_v29 = vpop.eup %3420 }
 0x51a   :  { %v3423_v31 = vpop.eup %3422  ;;  %v1137_v32 = vmul.f32 %v3421_v29, %v1133_v25 }
 0x51b   :  { %v1138_v33 = vmul.f32 %v3423_v31, %v1134_v30 }
 0x51c   :  { %v1139_v34 = vadd.f32 %v1137_v32, %v4021_v39 }
 0x51d   :  { %v1140_v35 = vadd.f32 %v1138_v33, %v4026_v48 }
 0x51e   :  { %3424 = vtanh.f32 %v1139_v34 }
 0x51f   :  { %3426 = vtanh.f32 %v1140_v35 }
 0x528   :  { %v3425_v36 = vpop.eup %3424 }
 0x529   :  { %v3427_v37 = vpop.eup %3426  ;;  %v1145_v38 = vrot.slane %v3425_v36, 1 }
 0x52a   :  { %v1146_v41 = vrot.slane %v3427_v37, 1 }
 0x52b   :  { %v1149_v42 = vsub.f32 %v962_v28, %v1145_v38 }
 0x52c   :  { %v1150_v44 = vsub.f32 %v963_v2, %v1146_v41 }
 0x52d   :  { %v1153_v45 = vrot.slane %v1149_v42, 7 }
 0x52e   :  { %v1154_v46 = vrot.slane %v1150_v44, 7 }
 0x52f   :  { %1155 = vrot.lane.b32.xlu0 %v1153_v45, %s3552_s7 }
 0x530   :  { %1157 = vrot.lane.b32.xlu1 %v1154_v46, %s3552_s7 }
 0x5a1   :  { %v1156_v47 = vpop.permute.xlu0 %1155 }
 0x5a2   :  { %v1158_v49 = vpop.permute.xlu1 %1157  ;;  %v1161_v50 = vmul.f32 %v3421_v29, %v1156_v47 }
 0x5a3   :  { %v1162_v51 = vmul.f32 %v3423_v31, %v1158_v49 }
 0x5a4   :  { %1165 = vrot.lane.b32.xlu0 %v1161_v50, %s3553_s26 }
 0x5a5   :  { %1167 = vrot.lane.b32.xlu1 %v1162_v51, %s3553_s26 }
 0x616   :  { %v1166_v52 = vpop.permute.xlu0 %1165 }
 0x617   :  { %v1168_v53 = vpop.permute.xlu1 %1167  ;;  %v1171_v54 = vadd.f32 %v3425_v36, %v1166_v52 }
 0x618   :  { %v1172_v55 = vadd.f32 %v3427_v37, %v1168_v53 }
 0x619   :  { %1174 = vst.msk [vmem:[#allocation4] sm:$0x4] %vm1173_vm9, %v1171_v54  ;;  %v1178_v56 = vrot.slane %v1171_v54, 2 }
 0x61a   :  { %1175 = vst.msk [vmem:[#allocation4 + $0x8] sm:$0x4] %vm1173_vm9, %v1172_v55  ;;  %v1179_v57 = vrot.slane %v1172_v55, 1 }
 0x61c   :  { %v1180_v59 = vsel %vm733_vm6, %v1179_v57, %v1178_v56 }
 0x61d   :  { %3030 = vmatmul.mubr.msk.f32.vlgmr.msra.gmra.mrb[12].mxu1 %vm488_vm5, %v1180_v59  ;;  %3041 = vmatmul.mubr.msk.f32.vlgmr.msra.gmra.mrb[14].mxu0 %vm488_vm5, %v1180_v59 }
 0x61e   :  { %3312 = vmatpush3.bf16.msra.mxu1 %v3936_v0  ;;  %3318 = vmatpush3.bf16.msra.mxu0 %v3967_v9 }
 0x61f   :  { %3313 = vmatprep.subr.bf16.mxu1 %v3549_v1  ;;  %3319 = vmatprep.subr.bf16.mxu0 %v3549_v1 }
 0x620   :  { %3051 = vmatprep.mubr.msk.f32.mxu1 %vm3550_vm4, %v3551_v43  ;;  %3062 = vmatprep.mubr.msk.f32.mxu0 %vm3550_vm4, %v3551_v43 }
 0x622   :  { %3315 = vmatpush3.bf16.msra.mxu1 %v3955_v6  ;;  %3321 = vmatpush3.bf16.msra.mxu0 %v3990_v13 }
 0x623   :  { %3322 = vmatprep.subr.bf16.mxu1 %v3549_v1  ;;  %3328 = vmatprep.subr.bf16.mxu0 %v3549_v1 }
 0x6f0   :  { %v1249_v60 = vpop.f32.mrb[12].mxu1  ;;  %v1319_v61 = vpop.f32.mrb[14].mxu0 }
 0x6f1   :  { %v1324_v62 = vrot.slane %v1249_v60, 5  ;;  %v1325_v26 = vrot.slane %v1249_v60, 6  ;;  %v3031_v63 = vpop.f32.mrb[13].mxu1  ;;  %v3042_v2 = vpop.f32.mrb[15].mxu0  ;;  %v1320_v14 = vadd.f32 %v4032_v58, %v1319_v61 }
 0x6f3   :  { %v1328_v3 = vadd.f32 %v1324_v62, %v4014_v23  ;;  %v1329_v28 = vadd.f32 %v1325_v26, %v4016_v27  ;;  %v1343_v15 = vrot.slane %v1320_v14, 5  ;;  %v1344_v17 = vrot.slane %v1320_v14, 6 }
 0x6f5   :  { %v2697_v4 = vmul.f32 -1.442695, %v1328_v3  ;;  %v2698_v5 = vmul.f32 -1.442695, %v1329_v28 }
 0x6f7   :  { %3428 = vpow2.f32 %v2697_v4 }
 0x6f8   :  { %3430 = vpow2.f32 %v2698_v5 }
 0x701   :  { %v3429_v7 = vpop.eup %3428 }
 0x702   :  { %v3431_v8 = vpop.eup %3430  ;;  %v1336_v11 = vadd.f32 1.0, %v3429_v7 }
 0x703   :  { %v1337_v12 = vadd.f32 1.0, %v3431_v8 }
 0x704   :  { %3432 = vrcp.f32 %v1336_v11 }
 0x705   :  { %3434 = vrcp.f32 %v1337_v12 }
 0x70e   :  { %v3433_v16 = vpop.eup %3432 }
 0x70f   :  { %v3435_v18 = vpop.eup %3434  ;;  %v1347_v10 = vmul.f32 %v3433_v16, %v1343_v15 }
 0x710   :  { %v1348_v19 = vmul.f32 %v3435_v18, %v1344_v17 }
 0x711   :  { %v1349_v20 = vadd.f32 %v1347_v10, %v4021_v39 }
 0x712   :  { %v1350_v21 = vadd.f32 %v1348_v19, %v4026_v48 }
 0x713   :  { %3436 = vtanh.f32 %v1349_v20 }
 0x714   :  { %3438 = vtanh.f32 %v1350_v21 }
 0x71d   :  { %v3437_v22 = vpop.eup %3436 }
 0x71e   :  { %v3439_v24 = vpop.eup %3438  ;;  %v1355_v25 = vrot.slane %v3437_v22, 1 }
 0x71f   :  { %v1356_v29 = vrot.slane %v3439_v24, 1 }
 0x720   :  { %v1359_v30 = vsub.f32 %v1171_v54, %v1355_v25 }
 0x721   :  { %v1360_v31 = vsub.f32 %v1172_v55, %v1356_v29 }
 0x722   :  { %v1363_v32 = vrot.slane %v1359_v30, 7 }
 0x723   :  { %v1364_v33 = vrot.slane %v1360_v31, 7 }
 0x724   :  { %1365 = vrot.lane.b32.xlu0 %v1363_v32, %s3552_s7 }
 0x725   :  { %1367 = vrot.lane.b32.xlu1 %v1364_v33, %s3552_s7 }
 0x796   :  { %v1366_v34 = vpop.permute.xlu0 %1365 }
 0x797   :  { %v1368_v35 = vpop.permute.xlu1 %1367  ;;  %v1371_v36 = vmul.f32 %v3433_v16, %v1366_v34 }
 0x798   :  { %v1372_v37 = vmul.f32 %v3435_v18, %v1368_v35 }
 0x799   :  { %1375 = vrot.lane.b32.xlu0 %v1371_v36, %s3553_s26 }
 0x79a   :  { %1377 = vrot.lane.b32.xlu1 %v1372_v37, %s3553_s26 }
 0x80b   :  { %v1376_v38 = vpop.permute.xlu0 %1375 }
 0x80c   :  { %v1378_v41 = vpop.permute.xlu1 %1377  ;;  %v1381_v42 = vadd.f32 %v3437_v22, %v1376_v38 }
 0x80d   :  { %v1382_v44 = vadd.f32 %v3439_v24, %v1378_v41 }
 0x80e   :  { %1384 = vst.msk [vmem:[#allocation4] sm:$0x8] %vm1383_vm10, %v1381_v42  ;;  %v1388_v45 = vrot.slane %v1381_v42, 3 }
 0x80f   :  { %1385 = vst.msk [vmem:[#allocation4 + $0x8] sm:$0x8] %vm1383_vm10, %v1382_v44  ;;  %v1389_v46 = vrot.slane %v1382_v44, 2 }
 0x811   :  { %v1390_v47 = vsel %vm733_vm6, %v1389_v46, %v1388_v45 }
 0x812   :  { %3052 = vmatmul.mubr.msk.f32.vlgmr.msra.gmra.mrb[14].mxu1 %vm488_vm5, %v1390_v47  ;;  %3063 = vmatmul.mubr.msk.f32.vlgmr.msra.gmra.mrb[16].mxu0 %vm488_vm5, %v1390_v47 }
 0x813   :  { %3324 = vmatpush3.bf16.msra.mxu1 %v3936_v0  ;;  %3330 = vmatpush3.bf16.msra.mxu0 %v3967_v9 }
 0x814   :  { %3325 = vmatprep.subr.bf16.mxu1 %v3549_v1  ;;  %3331 = vmatprep.subr.bf16.mxu0 %v3549_v1 }
 0x815   :  { %3073 = vmatprep.mubr.msk.f32.mxu1 %vm3550_vm4, %v3551_v43  ;;  %3084 = vmatprep.mubr.msk.f32.mxu0 %vm3550_vm4, %v3551_v43 }
 0x817   :  { %3327 = vmatpush3.bf16.msra.mxu1 %v3955_v6  ;;  %3333 = vmatpush3.bf16.msra.mxu0 %v3990_v13 }
 0x818   :  { %3334 = vmatprep.subr.bf16.mxu1 %v3549_v1  ;;  %3340 = vmatprep.subr.bf16.mxu0 %v3549_v1 }
 0x8e5   :  { %v1459_v49 = vpop.f32.mrb[14].mxu1  ;;  %v1529_v50 = vpop.f32.mrb[16].mxu0 }
 0x8e6   :  { %v1534_v51 = vrot.slane %v1459_v49, 4  ;;  %v1535_v52 = vrot.slane %v1459_v49, 5  ;;  %v3053_v53 = vpop.f32.mrb[15].mxu1  ;;  %v3064_v54 = vpop.f32.mrb[17].mxu0  ;;  %v1530_v63 = vadd.f32 %v4032_v58, %v1529_v50 }
 0x8e8   :  { %v1538_v55 = vadd.f32 %v1534_v51, %v4014_v23  ;;  %v1539_v56 = vadd.f32 %v1535_v52, %v4016_v27  ;;  %v1553_v2 = vrot.slane %v1530_v63, 4  ;;  %v1554_v28 = vrot.slane %v1530_v63, 5 }
 0x8ea   :  { %v2701_v57 = vmul.f32 -1.442695, %v1538_v55  ;;  %v2702_v59 = vmul.f32 -1.442695, %v1539_v56 }
 0x8ec   :  { %3440 = vpow2.f32 %v2701_v57 }
 0x8ed   :  { %3442 = vpow2.f32 %v2702_v59 }
 0x8f6   :  { %v3441_v60 = vpop.eup %3440 }
 0x8f7   :  { %v3443_v61 = vpop.eup %3442  ;;  %v1546_v62 = vadd.f32 1.0, %v3441_v60 }
 0x8f8   :  { %v1547_v26 = vadd.f32 1.0, %v3443_v61 }
 0x8f9   :  { %3444 = vrcp.f32 %v1546_v62 }
 0x8fa   :  { %3446 = vrcp.f32 %v1547_v26 }
 0x903   :  { %v3445_v3 = vpop.eup %3444 }
 0x904   :  { %v3447_v4 = vpop.eup %3446  ;;  %v1557_v5 = vmul.f32 %v3445_v3, %v1553_v2 }
 0x905   :  { %v1558_v7 = vmul.f32 %v3447_v4, %v1554_v28 }
 0x906   :  { %v1559_v8 = vadd.f32 %v1557_v5, %v4021_v39 }
 0x907   :  { %v1560_v11 = vadd.f32 %v1558_v7, %v4026_v48 }
 0x908   :  { %3448 = vtanh.f32 %v1559_v8 }
 0x909   :  { %3450 = vtanh.f32 %v1560_v11 }
 0x912   :  { %v3449_v12 = vpop.eup %3448 }
 0x913   :  { %v3451_v14 = vpop.eup %3450  ;;  %v1565_v15 = vrot.slane %v3449_v12, 1 }
 0x914   :  { %v1566_v16 = vrot.slane %v3451_v14, 1 }
 0x915   :  { %v1569_v17 = vsub.f32 %v1381_v42, %v1565_v15 }
 0x916   :  { %v1570_v18 = vsub.f32 %v1382_v44, %v1566_v16 }
 0x917   :  { %v1573_v10 = vrot.slane %v1569_v17, 7 }
 0x918   :  { %v1574_v19 = vrot.slane %v1570_v18, 7 }
 0x919   :  { %1575 = vrot.lane.b32.xlu0 %v1573_v10, %s3552_s7 }
 0x91a   :  { %1577 = vrot.lane.b32.xlu1 %v1574_v19, %s3552_s7 }
 0x98b   :  { %v1576_v20 = vpop.permute.xlu0 %1575 }
 0x98c   :  { %v1578_v21 = vpop.permute.xlu1 %1577  ;;  %v1581_v22 = vmul.f32 %v3445_v3, %v1576_v20 }
 0x98d   :  { %v1582_v24 = vmul.f32 %v3447_v4, %v1578_v21 }
 0x98e   :  { %1585 = vrot.lane.b32.xlu0 %v1581_v22, %s3553_s26 }
 0x98f   :  { %1587 = vrot.lane.b32.xlu1 %v1582_v24, %s3553_s26 }
 0xa00   :  { %v1586_v25 = vpop.permute.xlu0 %1585 }
 0xa01   :  { %v1588_v29 = vpop.permute.xlu1 %1587  ;;  %v1591_v30 = vadd.f32 %v3449_v12, %v1586_v25 }
 0xa02   :  { %v1592_v31 = vadd.f32 %v3451_v14, %v1588_v29 }
 0xa03   :  { %1594 = vst.msk [vmem:[#allocation4] sm:$0x10] %vm1593_vm11, %v1591_v30  ;;  %v1598_v32 = vrot.slane %v1591_v30, 4 }
 0xa04   :  { %1595 = vst.msk [vmem:[#allocation4 + $0x8] sm:$0x10] %vm1593_vm11, %v1592_v31  ;;  %v1599_v33 = vrot.slane %v1592_v31, 3 }
 0xa06   :  { %v1600_v34 = vsel %vm733_vm6, %v1599_v33, %v1598_v32 }
 0xa07   :  { %3074 = vmatmul.mubr.msk.f32.vlgmr.msra.gmra.mrb[16].mxu1 %vm488_vm5, %v1600_v34  ;;  %3085 = vmatmul.mubr.msk.f32.vlgmr.msra.gmra.mrb[18].mxu0 %vm488_vm5, %v1600_v34 }
 0xa08   :  { %3336 = vmatpush3.bf16.msra.mxu1 %v3936_v0  ;;  %3342 = vmatpush3.bf16.msra.mxu0 %v3967_v9 }
 0xa09   :  { %3337 = vmatprep.subr.bf16.mxu1 %v3549_v1  ;;  %3343 = vmatprep.subr.bf16.mxu0 %v3549_v1 }
 0xa0a   :  { %3095 = vmatprep.mubr.msk.f32.mxu1 %vm3550_vm4, %v3551_v43  ;;  %3106 = vmatprep.mubr.msk.f32.mxu0 %vm3550_vm4, %v3551_v43 }
 0xa0c   :  { %3339 = vmatpush3.bf16.msra.mxu1 %v3955_v6  ;;  %3345 = vmatpush3.bf16.msra.mxu0 %v3990_v13 }
 0xa0d   :  { %3346 = vmatprep.subr.bf16.mxu1 %v3549_v1  ;;  %3352 = vmatprep.subr.bf16.mxu0 %v3549_v1 }
 0xada   :  { %v1669_v35 = vpop.f32.mrb[16].mxu1  ;;  %v1739_v36 = vpop.f32.mrb[18].mxu0 }
 0xadb   :  { %v1744_v37 = vrot.slane %v1669_v35, 3  ;;  %v1745_v38 = vrot.slane %v1669_v35, 4  ;;  %v3075_v41 = vpop.f32.mrb[17].mxu1  ;;  %v3086_v42 = vpop.f32.mrb[19].mxu0  ;;  %v1740_v53 = vadd.f32 %v4032_v58, %v1739_v36 }
 0xadd   :  { %v1748_v44 = vadd.f32 %v1744_v37, %v4014_v23  ;;  %v1749_v45 = vadd.f32 %v1745_v38, %v4016_v27  ;;  %v1763_v54 = vrot.slane %v1740_v53, 3  ;;  %v1764_v56 = vrot.slane %v1740_v53, 4 }
 0xadf   :  { %v2705_v46 = vmul.f32 -1.442695, %v1748_v44  ;;  %v2706_v47 = vmul.f32 -1.442695, %v1749_v45 }
 0xae1   :  { %3452 = vpow2.f32 %v2705_v46 }
 0xae2   :  { %3454 = vpow2.f32 %v2706_v47 }
 0xaeb   :  { %v3453_v49 = vpop.eup %3452 }
 0xaec   :  { %v3455_v50 = vpop.eup %3454  ;;  %v1756_v51 = vadd.f32 1.0, %v3453_v49 }
 0xaed   :  { %v1757_v52 = vadd.f32 1.0, %v3455_v50 }
 0xaee   :  { %3456 = vrcp.f32 %v1756_v51 }
 0xaef   :  { %3458 = vrcp.f32 %v1757_v52 }
 0xaf8   :  { %v3457_v55 = vpop.eup %3456 }
 0xaf9   :  { %v3459_v57 = vpop.eup %3458  ;;  %v1767_v59 = vmul.f32 %v3457_v55, %v1763_v54 }
 0xafa   :  { %v1768_v60 = vmul.f32 %v3459_v57, %v1764_v56 }
 0xafb   :  { %v1769_v61 = vadd.f32 %v1767_v59, %v4021_v39 }
 0xafc   :  { %v1770_v62 = vadd.f32 %v1768_v60, %v4026_v48 }
 0xafd   :  { %3460 = vtanh.f32 %v1769_v61 }
 0xafe   :  { %3462 = vtanh.f32 %v1770_v62 }
 0xb07   :  { %v3461_v26 = vpop.eup %3460 }
 0xb08   :  { %v3463_v63 = vpop.eup %3462  ;;  %v1775_v2 = vrot.slane %v3461_v26, 1 }
 0xb09   :  { %v1776_v3 = vrot.slane %v3463_v63, 1 }
 0xb0a   :  { %v1779_v28 = vsub.f32 %v1591_v30, %v1775_v2 }
 0xb0b   :  { %v1780_v4 = vsub.f32 %v1592_v31, %v1776_v3 }
 0xb0c   :  { %v1783_v5 = vrot.slane %v1779_v28, 7 }
 0xb0d   :  { %v1784_v7 = vrot.slane %v1780_v4, 7 }
 0xb0e   :  { %1785 = vrot.lane.b32.xlu0 %v1783_v5, %s3552_s7 }
 0xb0f   :  { %1787 = vrot.lane.b32.xlu1 %v1784_v7, %s3552_s7 }
 0xb80   :  { %v1786_v8 = vpop.permute.xlu0 %1785 }
 0xb81   :  { %v1788_v11 = vpop.permute.xlu1 %1787  ;;  %v1791_v12 = vmul.f32 %v3457_v55, %v1786_v8 }
 0xb82   :  { %v1792_v14 = vmul.f32 %v3459_v57, %v1788_v11 }
 0xb83   :  { %1795 = vrot.lane.b32.xlu0 %v1791_v12, %s3553_s26 }
 0xb84   :  { %1797 = vrot.lane.b32.xlu1 %v1792_v14, %s3553_s26 }
 0xbf5   :  { %v1796_v15 = vpop.permute.xlu0 %1795 }
 0xbf6   :  { %v1798_v16 = vpop.permute.xlu1 %1797  ;;  %v1801_v17 = vadd.f32 %v3461_v26, %v1796_v15 }
 0xbf7   :  { %v1802_v18 = vadd.f32 %v3463_v63, %v1798_v16 }
 0xbf8   :  { %1804 = vst.msk [vmem:[#allocation4] sm:$0x20] %vm1803_vm12, %v1801_v17  ;;  %v1808_v10 = vrot.slane %v1801_v17, 5 }
 0xbf9   :  { %1805 = vst.msk [vmem:[#allocation4 + $0x8] sm:$0x20] %vm1803_vm12, %v1802_v18  ;;  %v1809_v19 = vrot.slane %v1802_v18, 4 }
 0xbfb   :  { %v1810_v20 = vsel %vm733_vm6, %v1809_v19, %v1808_v10 }
 0xbfc   :  { %3096 = vmatmul.mubr.msk.f32.vlgmr.msra.gmra.mrb[18].mxu1 %vm488_vm5, %v1810_v20  ;;  %3107 = vmatmul.mubr.msk.f32.vlgmr.msra.gmra.mrb[20].mxu0 %vm488_vm5, %v1810_v20 }
 0xbfd   :  { %3348 = vmatpush3.bf16.msra.mxu1 %v3936_v0  ;;  %3354 = vmatpush3.bf16.msra.mxu0 %v3967_v9 }
 0xbfe   :  { %3349 = vmatprep.subr.bf16.mxu1 %v3549_v1  ;;  %3355 = vmatprep.subr.bf16.mxu0 %v3549_v1 }
 0xbff   :  { %3117 = vmatprep.mubr.msk.f32.mxu1 %vm3550_vm4, %v3551_v43  ;;  %3128 = vmatprep.mubr.msk.f32.mxu0 %vm3550_vm4, %v3551_v43 }
 0xc01   :  { %3351 = vmatpush3.bf16.msra.mxu1 %v3955_v6  ;;  %3357 = vmatpush3.bf16.msra.mxu0 %v3990_v13 }
 0xc02   :  { %3366 = vmatprep.subr.bf16.mxu0 %v3549_v1 }
 0xccf   :  { %v1879_v21 = vpop.f32.mrb[18].mxu1  ;;  %v1949_v0 = vpop.f32.mrb[20].mxu0 }
 0xcd0   :  { %v1954_v22 = vrot.slane %v1879_v21, 2  ;;  %v1955_v9 = vrot.slane %v1879_v21, 3  ;;  %v3097_v24 = vpop.f32.mrb[19].mxu1  ;;  %v3108_v25 = vpop.f32.mrb[21].mxu0  ;;  %v1950_v35 = vadd.f32 %v4032_v58, %v1949_v0 }
 0xcd2   :  { %v1958_v29 = vadd.f32 %v1954_v22, %v4014_v23  ;;  %v1959_v30 = vadd.f32 %v1955_v9, %v4016_v27  ;;  %v1973_v36 = vrot.slane %v1950_v35, 2  ;;  %v1974_v38 = vrot.slane %v1950_v35, 3 }
 0xcd4   :  { %v2709_v31 = vmul.f32 -1.442695, %v1958_v29  ;;  %v2710_v32 = vmul.f32 -1.442695, %v1959_v30  ;;  %v2475_v30 = vld [vmem:[%s4328_s14] sm:$0xff] }
 0xcd6   :  { %3464 = vpow2.f32 %v2709_v31 }
 0xcd7   :  { %3466 = vpow2.f32 %v2710_v32 }
 0xce0   :  { %v3465_v33 = vpop.eup %3464 }
 0xce1   :  { %v3467_v6 = vpop.eup %3466  ;;  %v1966_v34 = vadd.f32 1.0, %v3465_v33 }
 0xce2   :  { %v1967_v13 = vadd.f32 1.0, %v3467_v6 }
 0xce3   :  { %3468 = vrcp.f32 %v1966_v34 }
 0xce4   :  { %3470 = vrcp.f32 %v1967_v13 }
 0xced   :  { %v3469_v37 = vpop.eup %3468 }
 0xcee   :  { %v3471_v41 = vpop.eup %3470  ;;  %v1977_v42 = vmul.f32 %v3469_v37, %v1973_v36  ;;  %v2477_v36 = vld [vmem:[%s4328_s14 + $0x10] sm:$0xff] }
 0xcef   :  { %v1978_v44 = vmul.f32 %v3471_v41, %v1974_v38 }
 0xcf0   :  { %v1979_v45 = vadd.f32 %v1977_v42, %v4021_v39  ;;  %v2236_v42 = vld [vmem:[%s4324_s10 + $0x8] sm:$0xff] }
 0xcf1   :  { %v1980_v46 = vadd.f32 %v1978_v44, %v4026_v48 }
 0xcf2   :  { %3472 = vtanh.f32 %v1979_v45  ;;  %v2237_v45 = vld [vmem:[%s4324_s10 + $0x10] sm:$0xff] }
 0xcf3   :  { %3474 = vtanh.f32 %v1980_v46  ;;  %v2238_v46 = vld [vmem:[%s4324_s10 + $0x18] sm:$0xff] }
 0xcfc   :  { %v3473_v47 = vpop.eup %3472 }
 0xcfd   :  { %v3475_v49 = vpop.eup %3474  ;;  %v1985_v50 = vrot.slane %v3473_v47, 1 }
 0xcfe   :  { %v1986_v51 = vrot.slane %v3475_v49, 1 }
 0xcff   :  { %v1989_v52 = vsub.f32 %v1801_v17, %v1985_v50 }
 0xd00   :  { %v1990_v53 = vsub.f32 %v1802_v18, %v1986_v51 }
 0xd01   :  { %v1993_v54 = vrot.slane %v1989_v52, 7 }
 0xd02   :  { %v1994_v55 = vrot.slane %v1990_v53, 7 }
 0xd03   :  { %1995 = vrot.lane.b32.xlu0 %v1993_v54, %s3552_s7 }
 0xd04   :  { %1997 = vrot.lane.b32.xlu1 %v1994_v55, %s3552_s7 }
 0xd75   :  { %v1996_v56 = vpop.permute.xlu0 %1995 }
 0xd76   :  { %v1998_v57 = vpop.permute.xlu1 %1997  ;;  %v2001_v59 = vmul.f32 %v3469_v37, %v1996_v56  ;;  %v2478_v37 = vld [vmem:[%s4328_s14 + $0x18] sm:$0xff] }
 0xd77   :  { %v2002_v60 = vmul.f32 %v3471_v41, %v1998_v57  ;;  %v3370_v38 = vpack.c.bf16 %v2478_v37, %v2477_v36  ;;  %v2235_v41 = vld [vmem:[%s4324_s10] sm:$0xff] }
 0xd78   :  { %2005 = vrot.lane.b32.xlu0 %v2001_v59, %s3553_s26  ;;  %v3358_v44 = vpack.c.bf16 %v2236_v42, %v2235_v41 }
 0xd79   :  { %2007 = vrot.lane.b32.xlu1 %v2002_v60, %s3553_s26 }
 0xd7a   :  { %3359 = vmatprep.subr.bf16.mxu1 %v3358_v44 }
 0xdea   :  { %v2006_v61 = vpop.permute.xlu0 %2005 }
 0xdeb   :  { %v2008_v62 = vpop.permute.xlu1 %2007  ;;  %v2011_v26 = vadd.f32 %v3473_v47, %v2006_v61  ;;  %v3362_v47 = vpack.c.bf16 %v2238_v46, %v2237_v45 }
 0xdec   :  { %v2012_v63 = vadd.f32 %v3475_v49, %v2008_v62 }
 0xded   :  { %2014 = vst.msk [vmem:[#allocation4] sm:$0x40] %vm2013_vm13, %v2011_v26  ;;  %v2018_v2 = vrot.slane %v2011_v26, 6 }
 0xdee   :  { %2015 = vst.msk [vmem:[#allocation4 + $0x8] sm:$0x40] %vm2013_vm13, %v2012_v63  ;;  %v2019_v3 = vrot.slane %v2012_v63, 5 }
 0xdf0   :  { %v2020_v28 = vsel %vm733_vm6, %v2019_v3, %v2018_v2  ;;  %v2324_v3 = vlaneseq }
 0xdf1   :  { %3118 = vmatmul.mubr.msk.f32.vlgmr.msra.gmra.mrb[20].mxu1 %vm488_vm5, %v2020_v28  ;;  %3129 = vmatmul.mubr.msk.f32.vlgmr.msra.gmra.mrb[22].mxu0 %vm488_vm5, %v2020_v28 }
 0xdf2   :  { %3150 = vmatprep.mubr.msk.f32.mxu0 %vm3550_vm4, %v3551_v43  ;;  %3361 = vmatpush3.bf16.msra.mxu1 %v3358_v44 }
 0xdf3   :  { %3363 = vmatprep.subr.bf16.mxu1 %v3362_v47 }
 0xdf6   :  { %3365 = vmatpush3.bf16.msra.mxu1 %v3362_v47 }
 0xdf7   :  { %3372 = vmatprep.subr.bf16.mxu1 %v3549_v1 }
 0xec4   :  { %v2089_v4 = vpop.f32.mrb[20].mxu1  ;;  %v2159_v5 = vpop.f32.mrb[22].mxu0 }
 0xec5   :  { %v2164_v7 = vrot.slane %v2089_v4, 1  ;;  %v2165_v8 = vrot.slane %v2089_v4, 2  ;;  %v3119_v11 = vpop.f32.mrb[21].mxu1  ;;  %v3130_v12 = vpop.f32.mrb[23].mxu0  ;;  %v2160_v21 = vadd.f32 %v4032_v58, %v2159_v5  ;;  %v2476_v58 = vld [vmem:[%s4328_s14 + $0x8] sm:$0xff]  ;;  %v4235_v4 = vshrl.u32 %v2324_v3, 7 }
 0xec6   :  { %v3367_v31 = vpack.c.bf16 %v2476_v58, %v2475_v30 }
 0xec7   :  { %v2168_v14 = vadd.f32 %v2164_v7, %v4014_v23  ;;  %v2169_v15 = vadd.f32 %v2165_v8, %v4016_v27  ;;  %v2183_v0 = vrot.slane %v2160_v21, 1  ;;  %v2184_v9 = vrot.slane %v2160_v21, 2 }
 0xec8   :  { %3368 = vmatpush3.bf16.msra.mxu0 %v3367_v31 }
 0xec9   :  { %v2713_v16 = vmul.f32 -1.442695, %v2168_v14  ;;  %v2714_v17 = vmul.f32 -1.442695, %v2169_v15  ;;  %3369 = vmatprep.subr.bf16.mxu0 %v3549_v1 }
 0xecb   :  { %3476 = vpow2.f32 %v2713_v16  ;;  %v2345_v16 = vsub.s32 0, %v4235_v4 }
 0xecc   :  { %3478 = vpow2.f32 %v2714_v17  ;;  %3371 = vmatpush3.bf16.msra.mxu0 %v3370_v38 }
 0xed5   :  { %v3477_v18 = vpop.eup %3476 }
 0xed6   :  { %v3479_v10 = vpop.eup %3478  ;;  %v2176_v19 = vadd.f32 1.0, %v3477_v18 }
 0xed7   :  { %v2177_v20 = vadd.f32 1.0, %v3479_v10 }
 0xed8   :  { %3480 = vrcp.f32 %v2176_v19 }
 0xed9   :  { %3482 = vrcp.f32 %v2177_v20 }
 0xee2   :  { %v3481_v22 = vpop.eup %3480 }
 0xee3   :  { %v3483_v24 = vpop.eup %3482  ;;  %v2187_v25 = vmul.f32 %v3481_v22, %v2183_v0 }
 0xee4   :  { %v2188_v23 = vmul.f32 %v3483_v24, %v2184_v9 }
 0xee5   :  { %v2189_v27 = vadd.f32 %v2187_v25, %v4021_v39 }
 0xee6   :  { %v2190_v29 = vadd.f32 %v2188_v23, %v4026_v48  ;;  %v2375_v23 = vand.u32 127, %v2324_v3 }
 0xee7   :  { %3484 = vtanh.f32 %v2189_v27 }
 0xee8   :  { %3486 = vtanh.f32 %v2190_v29  ;;  %v2378_v27 = vsub.s32 %v2375_v23, %v4235_v4 }
 0xef1   :  { %v3485_v32 = vpop.eup %3484 }
 0xef2   :  { %v3487_v33 = vpop.eup %3486  ;;  %v2195_v6 = vrot.slane %v3485_v32, 1 }
 0xef3   :  { %v2196_v39 = vrot.slane %v3487_v33, 1 }
 0xef4   :  { %v2199_v34 = vsub.f32 %v2011_v26, %v2195_v6  ;;  %v3555_v6 = vmov 0  }
 0xef5   :  { %v2200_v48 = vsub.f32 %v2012_v63, %v2196_v39  ;;  %v3554_v63 = vmov 1966171168   ;;  %3391 = vset.pattern.permute.xlu1 %v3555_v6  ;;  %3390 = vset.pattern.permute.xlu0 %v3555_v6  ;;  %v2397_v39 = vsub.s32 1, %v4235_v4 }
 0xef6   :  { %v2203_v13 = vrot.slane %v2199_v34, 7  ;;  %v2322_v2 = vunpack.c.l.s4 %v3554_v63 }
 0xef7   :  { %v2204_v35 = vrot.slane %v2200_v48, 7 }
 0xef8   :  { %2205 = vrot.lane.b32.xlu0 %v2203_v13, %s3552_s7  ;;  %v2323_v28 = vunpack.c.0.s8 %v2322_v2  ;;  %v2443_v2 = vld [vmem:[%s4342_s29] sm:$0xff] }
 0xef9   :  { %2207 = vrot.lane.b32.xlu1 %v2204_v35, %s3552_s7 }
 0xefa   :  { %v2326_v5 = vsub.s32 %v2323_v28, %v4235_v4 }
 0xefc   :  { %v2327_v7 = vrot.slane %v4023_v40, %v2326_v5  ;;  %v2717_v40 = vld [vmem:[%s4326_s12] ss:$0 sm:$0xff] }
 0xefe   :  { %v2328_v8 = vcombine.high %v2327_v7, %v2327_v7  ;;  %v2335_v14 = vrot.slane %v2327_v7, %v2326_v5 }
 0xf00   :  { %v2342_v12 = vrot.slane %v2328_v8, %v2326_v5  ;;  %v2346_v18 = vrot.slane %v2335_v14, %v2345_v16 }
 0xf02   :  { %v2350_v17 = vrot.slane %v2342_v12, %v2345_v16 }
 0xf6a   :  { %v2206_v49 = vpop.permute.xlu0 %2205 }
 0xf6b   :  { %v2208_v50 = vpop.permute.xlu1 %2207  ;;  %v2211_v51 = vmul.f32 %v3481_v22, %v2206_v49 }
 0xf6c   :  { %v2212_v52 = vmul.f32 %v3483_v24, %v2208_v50 }
 0xf6d   :  { %2215 = vrot.lane.b32.xlu0 %v2211_v51, %s3553_s26 }
 0xf6e   :  { %2217 = vrot.lane.b32.xlu1 %v2212_v52, %s3553_s26 }
 0xfdf   :  { %v2216_v53 = vpop.permute.xlu0 %2215 }
 0xfe0   :  { %v2218_v54 = vpop.permute.xlu1 %2217  ;;  %v2221_v55 = vadd.f32 %v3485_v32, %v2216_v53 }
 0xfe1   :  { %v2222_v56 = vadd.f32 %v3487_v33, %v2218_v54 }
 0xfe2   :  { %2224 = vst.msk [vmem:[#allocation4] sm:$0x80] %vm2223_vm14, %v2221_v55  ;;  %v2479_v57 = vrot.slane %v2221_v55, 7  ;;  %2231 = vst.msk [vmem:[#allocation2 - $0x7] sm:$0x80] %vm2223_vm14, %v2221_v55 }
 0xfe3   :  { %2225 = vst.msk [vmem:[#allocation4 + $0x8] sm:$0x80] %vm2223_vm14, %v2222_v56  ;;  %v2480_v59 = vrot.slane %v2222_v56, 6  ;;  %v2228_v60 = vrot.slane %v2222_v56, 7 }
 0xfe5   :  { %v2481_v61 = vsel %vm733_vm6, %v2480_v59, %v2479_v57  ;;  %2232 = vst.msk [vmem:[#allocation2 + $0x1] sm:$0x1] %vm757_vm7, %v2228_v60  ;;  %v2471_v59 = vld [vmem:[%s4327_s13] sm:$0xff]  ;;  %v2472_v60 = vld [vmem:[%s4327_s13 + $0x8] sm:$0xff] }
 0xfe6   :  { %3151 = vmatmul.mubr.msk.f32.vlgmr.msra.gmra.mrb[24].mxu0 %vm488_vm5, %v2481_v61  ;;  %v3373_v61 = vpack.c.bf16 %v2472_v60, %v2471_v59 }
 0xfe9   :  { %v2233_v62 = vld [vmem:[#allocation4] sm:$0xff] }
 0xfea   :  { %3139 = vmatprep.mubr.msk.f32.mxu1 %vm488_vm5, %v2233_v62  ;;  %v2234_v26 = vld [vmem:[#allocation4 + $0x8] sm:$0xff] }
 0xfeb   :  { %3140 = vmatmul.mubr.msk.f32.vlgmr.msra.gmra.mrb[22].mxu1 %vm488_vm5, %v2234_v26  ;;  %v2473_v62 = vld [vmem:[%s4327_s13 + $0x10] sm:$0xff]  ;;  %v2474_v26 = vld [vmem:[%s4327_s13 + $0x18] sm:$0xff]  ;;  %s3556_s13 = smov [#allocation2]  }
 0xfec   :  { %3161 = vmatprep.mubr.msk.f32.mxu1 %vm3550_vm4, %v3551_v43  ;;  %3374 = vmatpush3.bf16.msra.mxu1 %v3373_v61  ;;  %v3376_v63 = vpack.c.bf16 %v2474_v26, %v2473_v62  ;;  %s2647_s0 = sshll.u32 %s3556_s13, 4  ;;  %s2648_s0 = int_to_ptr.vmem [resolvable:$true] %s2647_s0 }
 0xfed   :  { %3375 = vmatprep.subr.bf16.mxu1 %v3549_v1  ;;  %v2444_v1 = vld [vmem:[%s4342_s29 + $0x8] sm:$0xff]  ;;  %s3500_s8 = scalar_lea.vmem %s2648_s0, 32  ;;  %p3505_p1 = scmp.lt.s32.totalorder %s2648_s0, %s2648_s0 }
 0xfee   :  { %p3501_p0 = scmp.ne.s32.totalorder %s2648_s0, %s3500_s8  ;;  %p3506_p2 = scmp.lt.s32.totalorder %s3500_s8, %s3500_s8 }
 0xff0   :  { %3377 = vmatpush3.bf16.msra.mxu1 %v3376_v63  ;;  %p3507_p3 = por %p3506_p2, %p3505_p1 }
 0xff2   :  { %p3508_p4 = pnand %p3507_p3, %p3501_p0 }
0x10b9   :  { %v4239_v11 = vpop.f32.mrb[24].mxu0 }
0x10ba   :  { %v3152_v15 = vpop.f32.mrb[25].mxu0 }
0x10be   :  { %v3141_v43 = vpop.f32.mrb[22].mxu1 }
0x10bf   :  { %v2354_v10 = vadd.f32 %v3141_v43, %v2350_v17  ;;  %v2311_v19 = vpop.f32.mrb[23].mxu1 }
0x10c0   :  { %v2353_v20 = vadd.f32 %v2346_v18, %v2311_v19 }
0x10c1   :  { %3488 = vtanh.f32 %v2354_v10 }
0x10c2   :  { %3490 = vtanh.f32 %v2353_v20 }
0x10cb   :  { %v3489_v21 = vpop.eup %3488 }
0x10cc   :  { %v3491_v0 = vpop.eup %3490  ;;  %v2365_v22 = vmul.f32 %v3489_v21, %v2717_v40 }
0x10cd   :  { %v2364_v9 = vmul.f32 %v3491_v0, %v2717_v40 }
0x10ce   :  { %v2369_v24 = vsel %vm488_vm5, %v2365_v22, 0.0 }
0x10cf   :  { %2370 = vadd.xlane.f32.xlu1 %v2369_v24  ;;  %v2366_v25 = vsel %vm488_vm5, %v2364_v9, 0.0 }
0x10d0   :  { %2367 = vadd.xlane.f32.xlu0 %v2366_v25 }
0x115c   :  { %v2371_v29 = vpop.xlane.xlu1 %2370 }
0x115d   :  { %v2383_v30 = vrot.slane %v2371_v29, %v2378_v27  ;;  %v2368_v58 = vpop.xlane.xlu0 %2367 }
0x115e   :  { %v2379_v31 = vrot.slane %v2368_v58, %v2378_v27 }
0x1160   :  { %v2384_v32 = vsel %vm733_vm6, %v2383_v30, %v2379_v31 }
0x1161   :  { %v2387_v33 = vsel %vm2386_vm15, %v2384_v32, -inf }
0x1162   :  { %2388 = vmax.xlane.f32.xlu0 %v2387_v33 }
0x11ef   :  { %v2389_v34 = vpop.xlane.xlu0 %2388 }
0x11f0   :  { %v2394_v48 = vrot.slane %v2389_v34, %v2345_v16  ;;  %v2398_v13 = vrot.slane %v2389_v34, %v2397_v39 }
0x11f2   :  { %v2401_v35 = vsub.f32 %v2368_v58, %v2394_v48  ;;  %v2402_v36 = vsub.f32 %v2371_v29, %v2398_v13 }
0x11f4   :  { %v2403_v37 = vmul.f32 1.442695, %v2401_v35  ;;  %v2405_v38 = vmul.f32 1.442695, %v2402_v36 }
0x11f6   :  { %3492 = vpow2.f32 %v2403_v37 }
0x11f7   :  { %3494 = vpow2.f32 %v2405_v38 }
0x1200   :  { %v3493_v41 = vpop.eup %3492 }
0x1201   :  { %v3495_v42 = vpop.eup %3494  ;;  %2410 = vperm.xlu0 %3390, %v3493_v41  }
0x1202   :  { %2413 = vperm.xlu1 %3391, %v3495_v42  }
0x1280   :  { %v2411_v44 = vpop.permute.xlu0 %2410 }
0x1281   :  { %v2414_v45 = vpop.permute.xlu1 %2413  ;;  %v2418_v46 = vrot.slane %v2411_v44, %v2378_v27 }
0x1282   :  { %v2422_v47 = vrot.slane %v2414_v45, %v2378_v27 }
0x1284   :  { %v2423_v49 = vsel %vm733_vm6, %v2422_v47, %v2418_v46 }
0x1285   :  { %v2425_v50 = vsel %vm2386_vm15, %v2423_v49, 0.0 }
0x1286   :  { %2426 = vadd.xlane.f32.xlu1 %v2425_v50 }
0x1313   :  { %v2427_v51 = vpop.xlane.xlu1 %2426 }
0x1314   :  { %v2432_v52 = vrot.slane %v2427_v51, %v2345_v16  ;;  %v2436_v53 = vrot.slane %v2427_v51, %v2397_v39 }
0x1316   :  { %3496 = vrcp.f32 %v2432_v52 }
0x1317   :  { %3498 = vrcp.f32 %v2436_v53 }
0x1320   :  { %v3497_v54 = vpop.eup %3496 }
0x1321   :  { %v2440_v55 = vmul.f32 %v3497_v54, %v3493_v41  ;;  %v3499_v56 = vpop.eup %3498 }
0x1322   :  { %v2442_v57 = vmul.f32 %v3499_v56, %v3495_v42 }
0x1323   :  { %2447 = vperm.xlu0 %3390, %v2440_v55  }
0x1327   :  { %2452 = vperm.xlu0 %3390, %v2442_v57  }
0x13a2   :  { %v2448_v3 = vpop.permute.xlu0 %2447 }
0x13a3   :  { %v2455_v28 = vmul.f32 %v2448_v3, %v2443_v2 }
0x13a5   :  { %v2457_v4 = vsel %vm488_vm5, %v2455_v28, 0.0 }
0x13a6   :  { %v2458_v5 = vrot.slane %v2457_v4, 4  ;;  %v2453_v7 = vpop.permute.xlu0 %2452 }
0x13a7   :  { %v2456_v8 = vmul.f32 %v2453_v7, %v2444_v1 }
0x13a8   :  { %v2459_v12 = vadd.f32 %v2458_v5, %v2457_v4 }
0x13a9   :  { %v2464_v14 = vsel %vm488_vm5, %v2456_v8, 0.0 }
0x13aa   :  { %v2460_v15 = vrot.slane %v2459_v12, 2  ;;  %v2465_v16 = vrot.slane %v2464_v14, 4 }
0x13ac   :  { %v2461_v17 = vadd.f32 %v2460_v15, %v2459_v12  ;;  %v2466_v43 = vadd.f32 %v2465_v16, %v2464_v14 }
0x13ae   :  { %v2467_v18 = vrot.slane %v2466_v43, 2  ;;  %v2462_v10 = vrot.slane %v2461_v17, 1 }
0x13b0   :  { %v2468_v19 = vadd.f32 %v2467_v18, %v2466_v43  ;;  %v2463_v40 = vadd.f32 %v2462_v10, %v2461_v17 }
0x13b2   :  { %v2469_v20 = vrot.slane %v2468_v19, 1 }
0x13b4   :  { %v2470_v21 = vadd.f32 %v2469_v20, %v2468_v19 }
0x13b6   :  { %v2556_v0 = vsel %vm733_vm6, %v2470_v21, %v2463_v40 }
0x13b7   :  { %3162 = vmatmul.mubr.msk.f32.vlgmr.msra.gmra.mrb[24].mxu1 %vm488_vm5, %v2556_v0 }
0x13b8   :  { %3511 = shalt.err (!%p3508_p4)
}
0x13b9   :  { %s3512_s4 = scalar_lea.hbm %s4331_s17, 32 }
0x13ba   :  { %p3513_p5 = scmp.ne.s32.totalorder %s4331_s17, %s3512_s4  ;;  %p3516_p6 = scmp.lt.u32.totalorder %s3512_s4, %s4331_s17 }
0x13bc   :  { %p3518_p7 = pnand %p3516_p6, %p3513_p5 }
0x13be   :  { %3521 = shalt.err (!%p3518_p7)
}
0x13bf   :  { %2650 = dma.vmem_to_hbm [thread:$0]  %s2648_s0, 32, %s4331_s17, [#allocation3]  }
0x13c0   :  { %s3522_s12 = scalar_lea.vmem %s4276_s19, 256  ;;  %p3527_p9 = scmp.lt.s32.totalorder %s4276_s19, %s4276_s19 }
0x13c1   :  { %p3523_p8 = scmp.ne.s32.totalorder %s4276_s19, %s3522_s12  ;;  %p3528_p10 = scmp.lt.s32.totalorder %s3522_s12, %s3522_s12 }
0x13c3   :  { %p3529_p11 = por %p3528_p10, %p3527_p9 }
0x13c5   :  { %p3530_p12 = pnand %p3529_p11, %p3523_p8 }
0x13c7   :  { %3533 = shalt.err (!%p3530_p12)
}
0x13c8   :  { %s3534_s3 = scalar_lea.hbm %s4332_s18, 256 }
0x13c9   :  { %p3535_p13 = scmp.ne.s32.totalorder %s4332_s18, %s3534_s3  ;;  %p3538_p0 = scmp.lt.u32.totalorder %s3534_s3, %s4332_s18 }
0x13cb   :  { %p3540_p1 = pnand %p3538_p0, %p3535_p13 }
0x13cd   :  { %3543 = shalt.err (!%p3540_p1)
}
0x13ce   :  { %s3558_s17 = smov 128   ;;  %s3559_s27 = smov 8   ;;  %v2720_v9 = vld [vmem:[%s4329_s15] ss:$0 sm:$0xff]  ;;  %vm2637_vm0 = vcmask 115712  }
0x13cf   :  { %2662 = dma.vmem_to_hbm [thread:$0]  %s4276_s19, 256, %s4332_s18, [#allocation5], %s3558_s17, %s3558_s17, %s3559_s27  }
0x148a   :  { %v2625_v22 = vpop.f32.mrb[24].mxu1 }
0x148b   :  { %v2626_v24 = vadd.f32 %v2625_v22, %v4239_v11  ;;  %v3163_v25 = vpop.f32.mrb[25].mxu1 }
0x148d   :  { %v2636_v23 = vadd.f32 %v2720_v9, %v2626_v24 }
0x148f   :  { %2638 = vst.msk [vmem:[%s4330_s16] sm:$0x3] %vm2637_vm0, %v2636_v23 }
0x1490   :  { %3544 = dma.done.wait [#allocation3], 32  }
0x1491   :  { %3545 = vsyncadd [#allocation3], 4294967264 }
0x1492   :  { %3546 = dma.done.wait [#allocation5], 256  }
0x1493   :  { %3547 = vsyncadd [#allocation5], 4294967040 }
0x1494   :  { %2671 = vsyncpa [#allocation3], 1 }
0x1495   :  { %2672 = vsyncpa [#allocation5], 1 }

</bundles_post_ra>
